<compile_context>
chip_gen: v5e
topology: v5e:2x2
jax: 0.10.0
libtpu: 0.0.40
codegen_flags: <defaults>
</compile_context>

<pallas_src>
import jax
import jax.numpy as jnp
import numpy as np
from jax import lax
from jax.experimental import pallas as pl
from jax.experimental.pallas import tpu as pltpu

NUM_CHANNELS = [32, 32, 32]
KERNEL_SIZE = 2  # taps per conv (dilated, causal after chomp)


# ----------------------------- Pallas kernel ---------------------------------

def _relu(x):
    return jnp.maximum(x, 0.0)


def make_tcn_kernel(num_inputs, tile_n, seq_len):
    # Static structure: which levels have a 1x1 downsample conv.
    ds_flags = []
    in_c = num_inputs
    for out_c in NUM_CHANNELS:
        ds_flags.append(in_c != out_c)
        in_c = out_c

    r = tile_n * seq_len  # flat rows per tile

    def tcn_kernel(*refs):
        x_ref = refs[0]
        o_ref = refs[-1]
        # Lazy parameter loads: each ref is read right before its matmul so at
        # most ~2 weight matrices are live at a time (no vreg spill pressure).
        param_refs = iter(refs[1:-1])

        h = x_ref[...]                                      # (R, C_in) f32

        # Hoisted row iota -> per-dilation causal masks (built once, reused).
        # t_mod is the within-sample time index; masking t%L < d also kills the
        # cross-sample / wrap-around rows introduced by the flat-layout roll.
        t_mod = lax.broadcasted_iota(jnp.int32, (r, 1), 0) % seq_len
        masks = [t_mod >= (2 ** i) for i in range(len(ds_flags))]

        for i, has_ds in enumerate(ds_flags):
            d = 2 ** i
            mask = masks[i]

            # ---- conv1 (+ fused 1x1 downsample residual when present) ----
            w1 = next(param_refs)[...]                      # (Cin, 2*Cout[+Cout]) bf16
            b1 = next(param_refs)[...]                      # (1, Cout) f32
            z = jnp.dot(h.astype(jnp.bfloat16), w1,
                        preferred_element_type=jnp.float32)
            if has_ds:
                ds_b = next(param_refs)[...]                # (1, Cout) f32
                cout = z.shape[-1] // 3
                res = z[:, 2 * cout:] + ds_b                # residual from same matmul
            else:
                cout = z.shape[-1] // 2
                res = h
            out = jnp.where(mask, pltpu.roll(z[:, :cout], shift=d, axis=0), 0.0)
            out = _relu(out + z[:, cout:2 * cout] + b1)

            # ---- conv2 ----
            w2 = next(param_refs)[...]                      # (Cout, 2*Cout) bf16
            b2 = next(param_refs)[...]                      # (1, Cout) f32
            z2 = jnp.dot(out.astype(jnp.bfloat16), w2,
                         preferred_element_type=jnp.float32)
            out = jnp.where(mask, pltpu.roll(z2[:, :cout], shift=d, axis=0), 0.0)
            out = _relu(out + z2[:, cout:] + b2)

            h = _relu(out + res)                            # (R, Cout) f32

        # ---- final FC on the last timestep of every sample ----
        fc_w = next(param_refs)[...]                        # (1, C_last) bf16
        fc_b = next(param_refs)[...]                        # (1, 1) f32
        c_last = h.shape[-1]
        last = h.reshape(tile_n, seq_len, c_last)[:, seq_len - 1, :]   # (TN, C)
        # (1, C) x (TN, C)^T -> (1, TN): lane-dense result, no transpose of y.
        y = lax.dot_general(fc_w, last.astype(jnp.bfloat16),
                            dimension_numbers=(((1,), (1,)), ((), ())),
                            preferred_element_type=jnp.float32) + fc_b
        o_ref[...] = y.reshape(1, 1, tile_n)

    return tcn_kernel


def _pick_tile_n(n, l):
    """Batch tile: VMEM-bounded (v7x safe) and >= 2-4 grid steps when N allows."""
    # ~6 live f32 activation buffers of (tile_n*L) rows x 128 lanes (32ch -> 128
    # lane padding), kept under ~24 MiB so the 48 MiB scoped limit leaves
    # double-buffering headroom even on v7x (64 MiB physical VMEM).
    per_row_bytes = 6 * l * 128 * 4
    max_by_vmem = max(8, ((24 * 1024 * 1024) // per_row_bytes) // 8 * 8)
    # >= 4 grid steps when N allows: megacore sharding on v7x + DMA overlap.
    quarter = max(8, (-(-n // 4) + 7) // 8 * 8)
    # 256 cap: larger M amortizes per-step overhead on v6e/v5e, still VMEM-safe.
    return int(min(256, max_by_vmem, quarter))


def _const_spec(p):
    nd = p.ndim
    return pl.BlockSpec(p.shape, lambda i, _nd=nd: (0,) * _nd)


def tcn_forward(x_ncl, kernel_params, tile_n=None):
    """x_ncl: (N, C_in, L) float32 (PyTorch layout). Returns (N,)."""
    n, c_in, l = x_ncl.shape
    if tile_n is None:
        tile_n = _pick_tile_n(n, l)
    n_pad = pl.cdiv(n, tile_n) * tile_n
    num_tiles = n_pad // tile_n

    x = jnp.transpose(x_ncl, (0, 2, 1))                     # (N, L, C_in)
    if n_pad != n:
        x = jnp.pad(x, ((0, n_pad - n), (0, 0), (0, 0)))
    x = x.reshape(n_pad * l, c_in)                          # flat rows, channels on lanes

    kernel = make_tcn_kernel(c_in, tile_n, l)

    in_specs = [pl.BlockSpec((tile_n * l, c_in), lambda i: (i, 0))] + \
               [_const_spec(p) for p in kernel_params]      # params stay resident

    out = pl.pallas_call(
        kernel,
        out_shape=jax.ShapeDtypeStruct((num_tiles, 1, tile_n), jnp.float32),
        grid=(num_tiles,),
        in_specs=in_specs,
        out_specs=pl.BlockSpec((1, 1, tile_n), lambda i: (i, 0, 0)),
        compiler_params=pltpu.CompilerParams(
            dimension_semantics=("parallel",),              # shard batch tiles across TCs
            vmem_limit_bytes=48 * 1024 * 1024),
    )(x, *kernel_params)
    return out.reshape(n_pad)[:n]                           # matches out.squeeze()


# ------------------------ deterministic parameter init -----------------------

def init_model(key, num_inputs):
    keys = iter(jax.random.split(key, 32))

    def normal(shape, scale=0.01):
        return (scale * jax.random.normal(next(keys), shape)).astype(jnp.float32)

    raw = {'levels': []}
    kparams = []
    in_c = num_inputs
    for i, out_c in enumerate(NUM_CHANNELS):
        d = 2 ** i
        w1 = normal((out_c, in_c, KERNEL_SIZE)); b1 = normal((out_c,), 0.1)
        w2 = normal((out_c, out_c, KERNEL_SIZE)); b2 = normal((out_c,), 0.1)
        lvl = dict(dilation=d, w1=w1, b1=b1, w2=w2, b2=b2, ds_w=None, ds_b=None)
        has_ds = in_c != out_c
        # Packed conv1 weight: columns = [tap0 (x[t-d]) | tap1 (x[t]) | (ds)].
        pieces = [w1[:, :, 0].T, w1[:, :, 1].T]
        if has_ds:
            ds_w = normal((out_c, in_c, 1)); ds_b = normal((out_c,), 0.1)
            lvl['ds_w'], lvl['ds_b'] = ds_w, ds_b
            pieces.append(ds_w[:, :, 0].T)
        w1p = jnp.concatenate(pieces, axis=1).astype(jnp.bfloat16)
        w2p = jnp.concatenate([w2[:, :, 0].T, w2[:, :, 1].T],
                              axis=1).astype(jnp.bfloat16)
        kparams += [w1p, b1[None, :]]
        if has_ds:
            kparams += [lvl['ds_b'][None, :]]
        kparams += [w2p, b2[None, :]]
        raw['levels'].append(lvl)
        in_c = out_c
    fc_w = normal((1, NUM_CHANNELS[-1])); fc_b = normal((1,), 0.1)
    raw['fc_w'], raw['fc_b'] = fc_w, fc_b
    kparams += [fc_w.astype(jnp.bfloat16), fc_b[None, :]]
    return raw, kparams


# ------------------------- plain-JAX reference (check) -----------------------

def ref_forward(x_ncl, raw):
    def conv(inp, w, b, dil):
        out = lax.conv_general_dilated(
            inp, w, window_strides=(1,), padding=[(dil, dil)],
            rhs_dilation=(dil,), dimension_numbers=('NCH', 'OIH', 'NCH'))
        out = out + b[None, :, None]
        return out[:, :, :inp.shape[2]]                     # chomp -> causal

    h = x_ncl
    for lvl in raw['levels']:
        d = lvl['dilation']
        out = jax.nn.relu(conv(h, lvl['w1'], lvl['b1'], d))
        out = jax.nn.relu(conv(out, lvl['w2'], lvl['b2'], d))
        if lvl['ds_w'] is not None:
            res = lax.conv_general_dilated(
                h, lvl['ds_w'], (1,), [(0, 0)],
                dimension_numbers=('NCH', 'OIH', 'NCH')) + lvl['ds_b'][None, :, None]
        else:
            res = h
        h = jax.nn.relu(out + res)
    last = h[:, :, -1]                                      # (N, C_last)
    y = last @ raw['fc_w'].T + raw['fc_b']
    return y[:, 0]


# ----------------------------------- main -------------------------------------

if __name__ == "__main__":
    key = jax.random.PRNGKey(0)
    k_x, k_p = jax.random.split(key)

    N, C_IN, L = 2, 4, 16
    x = jax.random.normal(k_x, (N, C_IN, L), dtype=jnp.float32)  # PyTorch NCL

    raw, kparams = init_model(k_p, C_IN)

    y = tcn_forward(x, kparams)
    y = jax.block_until_ready(y)

    y_ref = ref_forward(x, raw)
    # bf16 MXU operands with f32 accumulation -> loosened tolerance.
    np.testing.assert_allclose(np.asarray(y), np.asarray(y_ref),
                               rtol=2e-2, atol=1e-2)
    print("KERNEL_OK")
</pallas_src>

<mosaic_0001>
module attributes {stable_mosaic.version = 11 : i64} {
  func.func @tcn_kernel(%arg0: i32, %arg1: memref<128x4xf32, #tpu.memory_space<vmem>>, %arg2: memref<4x96xbf16, #tpu.memory_space<vmem>>, %arg3: memref<1x32xf32, #tpu.memory_space<vmem>>, %arg4: memref<1x32xf32, #tpu.memory_space<vmem>>, %arg5: memref<32x64xbf16, #tpu.memory_space<vmem>>, %arg6: memref<1x32xf32, #tpu.memory_space<vmem>>, %arg7: memref<32x64xbf16, #tpu.memory_space<vmem>>, %arg8: memref<1x32xf32, #tpu.memory_space<vmem>>, %arg9: memref<32x64xbf16, #tpu.memory_space<vmem>>, %arg10: memref<1x32xf32, #tpu.memory_space<vmem>>, %arg11: memref<32x64xbf16, #tpu.memory_space<vmem>>, %arg12: memref<1x32xf32, #tpu.memory_space<vmem>>, %arg13: memref<32x64xbf16, #tpu.memory_space<vmem>>, %arg14: memref<1x32xf32, #tpu.memory_space<vmem>>, %arg15: memref<1x32xbf16, #tpu.memory_space<vmem>>, %arg16: memref<1x1xf32, #tpu.memory_space<vmem>>, %arg17: memref<1x1x8xf32, #tpu.memory_space<vmem>>) attributes {dimension_semantics = [#tpu.dimension_semantics<parallel>], iteration_bounds = array<i64: 1>, scalar_prefetch = 0 : i64, scratch_operands = 0 : i64, tpu.core_type = #tpu.core_type<tc>, window_params = [{transform_indices = @transform_0, window_bounds = array<i64: 128, 4>}, {pipeline_mode = #tpu.pipeline_mode<synchronous>, transform_indices = @transform_1, window_bounds = array<i64: 4, 96>}, {pipeline_mode = #tpu.pipeline_mode<synchronous>, transform_indices = @transform_2, window_bounds = array<i64: 1, 32>}, {pipeline_mode = #tpu.pipeline_mode<synchronous>, transform_indices = @transform_3, window_bounds = array<i64: 1, 32>}, {pipeline_mode = #tpu.pipeline_mode<synchronous>, transform_indices = @transform_4, window_bounds = array<i64: 32, 64>}, {pipeline_mode = #tpu.pipeline_mode<synchronous>, transform_indices = @transform_5, window_bounds = array<i64: 1, 32>}, {pipeline_mode = #tpu.pipeline_mode<synchronous>, transform_indices = @transform_6, window_bounds = array<i64: 32, 64>}, {pipeline_mode = #tpu.pipeline_mode<synchronous>, transform_indices = @transform_7, window_bounds = array<i64: 1, 32>}, {pipeline_mode = #tpu.pipeline_mode<synchronous>, transform_indices = @transform_8, window_bounds = array<i64: 32, 64>}, {pipeline_mode = #tpu.pipeline_mode<synchronous>, transform_indices = @transform_9, window_bounds = array<i64: 1, 32>}, {pipeline_mode = #tpu.pipeline_mode<synchronous>, transform_indices = @transform_10, window_bounds = array<i64: 32, 64>}, {pipeline_mode = #tpu.pipeline_mode<synchronous>, transform_indices = @transform_11, window_bounds = array<i64: 1, 32>}, {pipeline_mode = #tpu.pipeline_mode<synchronous>, transform_indices = @transform_12, window_bounds = array<i64: 32, 64>}, {pipeline_mode = #tpu.pipeline_mode<synchronous>, transform_indices = @transform_13, window_bounds = array<i64: 1, 32>}, {pipeline_mode = #tpu.pipeline_mode<synchronous>, transform_indices = @transform_14, window_bounds = array<i64: 1, 32>}, {pipeline_mode = #tpu.pipeline_mode<synchronous>, transform_indices = @transform_15, window_bounds = array<i64: 1, 1>}, {transform_indices = @transform_16, window_bounds = array<i64: 1, 1, 8>}]} {
    %c0 = arith.constant 0 : index
    %c0_0 = arith.constant 0 : index
    %0 = vector.load %arg1[%c0, %c0_0] : memref<128x4xf32, #tpu.memory_space<vmem>>, vector<128x4xf32>
    %1 = tpu.iota {dimensions = array<i32: 0>} : vector<128x1xi32>
    %c16_i32 = arith.constant 16 : i32
    %c0_i32 = arith.constant 0 : i32
    %2 = arith.cmpi eq, %c16_i32, %c0_i32 : i32
    %c1_i32 = arith.constant 1 : i32
    %3 = arith.select %2, %c1_i32, %c16_i32 : i32
    %4 = vector.broadcast %3 : i32 to vector<128x1xi32>
    %5 = arith.remsi %1, %4 : vector<128x1xi32>
    %c0_i32_1 = arith.constant 0 : i32
    %6 = vector.broadcast %c0_i32_1 : i32 to vector<128x1xi32>
    %7 = arith.cmpi ne, %5, %6 : vector<128x1xi32>
    %c0_i32_2 = arith.constant 0 : i32
    %8 = vector.broadcast %c0_i32_2 : i32 to vector<128x1xi32>
    %9 = arith.cmpi slt, %5, %8 : vector<128x1xi32>
    %c0_i32_3 = arith.constant 0 : i32
    %10 = arith.cmpi slt, %3, %c0_i32_3 : i32
    %11 = vector.broadcast %10 : i1 to vector<128x1xi1>
    %12 = vector.broadcast %11 : vector<128x1xi1> to vector<128x1xi1>
    %13 = arith.xori %9, %12 : vector<128x1xi1>
    %14 = arith.andi %13, %7 : vector<128x1xi1>
    %15 = vector.broadcast %3 : i32 to vector<128x1xi32>
    %16 = arith.addi %5, %15 : vector<128x1xi32>
    %17 = arith.select %14, %16, %5 : vector<128x1xi1>, vector<128x1xi32>
    %c1_i32_4 = arith.constant 1 : i32
    %18 = vector.broadcast %c1_i32_4 : i32 to vector<128x1xi32>
    %19 = arith.cmpi sge, %17, %18 : vector<128x1xi32>
    %c2_i32 = arith.constant 2 : i32
    %20 = vector.broadcast %c2_i32 : i32 to vector<128x1xi32>
    %21 = arith.cmpi sge, %17, %20 : vector<128x1xi32>
    %c4_i32 = arith.constant 4 : i32
    %22 = vector.broadcast %c4_i32 : i32 to vector<128x1xi32>
    %23 = arith.cmpi sge, %17, %22 : vector<128x1xi32>
    %c0_5 = arith.constant 0 : index
    %c0_6 = arith.constant 0 : index
    %24 = vector.load %arg2[%c0_5, %c0_6] : memref<4x96xbf16, #tpu.memory_space<vmem>>, vector<4x96xbf16>
    %c0_7 = arith.constant 0 : index
    %c0_8 = arith.constant 0 : index
    %25 = vector.load %arg3[%c0_7, %c0_8] : memref<1x32xf32, #tpu.memory_space<vmem>>, vector<1x32xf32>
    %26 = arith.truncf %0 : vector<128x4xf32> to vector<128x4xbf16>
    %cst = arith.constant dense<0.000000e+00> : vector<128x96xf32>
    %27 = tpu.matmul %26, %24, %cst {dimension_numbers = #tpu.dot_dimension_numbers<[1], [0], [0], [1], [0, 0, 1, 1], [], []>} : vector<128x4xbf16>, vector<4x96xbf16>, vector<128x96xf32> -> vector<128x96xf32>
    %c0_9 = arith.constant 0 : index
    %c0_10 = arith.constant 0 : index
    %28 = vector.load %arg4[%c0_9, %c0_10] : memref<1x32xf32, #tpu.memory_space<vmem>>, vector<1x32xf32>
    %29 = vector.extract_strided_slice %27 {offsets = [0, 64], sizes = [128, 32], strides = [1, 1]} : vector<128x96xf32> to vector<128x32xf32>
    %30 = vector.broadcast %28 : vector<1x32xf32> to vector<128x32xf32>
    %31 = arith.addf %29, %30 : vector<128x32xf32>
    %32 = vector.extract_strided_slice %27 {offsets = [0, 0], sizes = [128, 32], strides = [1, 1]} : vector<128x96xf32> to vector<128x32xf32>
    %c1_i32_11 = arith.constant 1 : i32
    %33 = tpu.dynamic_rotate %32 by %c1_i32_11 dim 0 : vector<128x32xf32>, i32 -> vector<128x32xf32>
    %cst_12 = arith.constant 0.000000e+00 : f32
    %34 = vector.shape_cast %19 : vector<128x1xi1> to vector<128x1xi1>
    %35 = vector.broadcast %34 : vector<128x1xi1> to vector<128x32xi1>
    %36 = vector.broadcast %cst_12 : f32 to vector<128x32xf32>
    %37 = arith.select %35, %33, %36 : vector<128x32xi1>, vector<128x32xf32>
    %38 = vector.extract_strided_slice %27 {offsets = [0, 32], sizes = [128, 32], strides = [1, 1]} : vector<128x96xf32> to vector<128x32xf32>
    %39 = arith.addf %37, %38 : vector<128x32xf32>
    %40 = vector.broadcast %25 : vector<1x32xf32> to vector<128x32xf32>
    %41 = arith.addf %39, %40 : vector<128x32xf32>
    %cst_13 = arith.constant 0.000000e+00 : f32
    %42 = vector.broadcast %cst_13 : f32 to vector<128x32xf32>
    %43 = arith.maximumf %41, %42 : vector<128x32xf32>
    %c0_14 = arith.constant 0 : index
    %c0_15 = arith.constant 0 : index
    %44 = vector.load %arg5[%c0_14, %c0_15] : memref<32x64xbf16, #tpu.memory_space<vmem>>, vector<32x64xbf16>
    %c0_16 = arith.constant 0 : index
    %c0_17 = arith.constant 0 : index
    %45 = vector.load %arg6[%c0_16, %c0_17] : memref<1x32xf32, #tpu.memory_space<vmem>>, vector<1x32xf32>
    %46 = arith.truncf %43 : vector<128x32xf32> to vector<128x32xbf16>
    %cst_18 = arith.constant dense<0.000000e+00> : vector<128x64xf32>
    %47 = tpu.matmul %46, %44, %cst_18 {dimension_numbers = #tpu.dot_dimension_numbers<[1], [0], [0], [1], [0, 0, 1, 1], [], []>} : vector<128x32xbf16>, vector<32x64xbf16>, vector<128x64xf32> -> vector<128x64xf32>
    %48 = vector.extract_strided_slice %47 {offsets = [0, 0], sizes = [128, 32], strides = [1, 1]} : vector<128x64xf32> to vector<128x32xf32>
    %c1_i32_19 = arith.constant 1 : i32
    %49 = tpu.dynamic_rotate %48 by %c1_i32_19 dim 0 : vector<128x32xf32>, i32 -> vector<128x32xf32>
    %cst_20 = arith.constant 0.000000e+00 : f32
    %50 = vector.shape_cast %19 : vector<128x1xi1> to vector<128x1xi1>
    %51 = vector.broadcast %50 : vector<128x1xi1> to vector<128x32xi1>
    %52 = vector.broadcast %cst_20 : f32 to vector<128x32xf32>
    %53 = arith.select %51, %49, %52 : vector<128x32xi1>, vector<128x32xf32>
    %54 = vector.extract_strided_slice %47 {offsets = [0, 32], sizes = [128, 32], strides = [1, 1]} : vector<128x64xf32> to vector<128x32xf32>
    %55 = arith.addf %53, %54 : vector<128x32xf32>
    %56 = vector.broadcast %45 : vector<1x32xf32> to vector<128x32xf32>
    %57 = arith.addf %55, %56 : vector<128x32xf32>
    %cst_21 = arith.constant 0.000000e+00 : f32
    %58 = vector.broadcast %cst_21 : f32 to vector<128x32xf32>
    %59 = arith.maximumf %57, %58 : vector<128x32xf32>
    %60 = arith.addf %59, %31 : vector<128x32xf32>
    %cst_22 = arith.constant 0.000000e+00 : f32
    %61 = vector.broadcast %cst_22 : f32 to vector<128x32xf32>
    %62 = arith.maximumf %60, %61 : vector<128x32xf32>
    %c0_23 = arith.constant 0 : index
    %c0_24 = arith.constant 0 : index
    %63 = vector.load %arg7[%c0_23, %c0_24] : memref<32x64xbf16, #tpu.memory_space<vmem>>, vector<32x64xbf16>
    %c0_25 = arith.constant 0 : index
    %c0_26 = arith.constant 0 : index
    %64 = vector.load %arg8[%c0_25, %c0_26] : memref<1x32xf32, #tpu.memory_space<vmem>>, vector<1x32xf32>
    %65 = arith.truncf %62 : vector<128x32xf32> to vector<128x32xbf16>
    %cst_27 = arith.constant dense<0.000000e+00> : vector<128x64xf32>
    %66 = tpu.matmul %65, %63, %cst_27 {dimension_numbers = #tpu.dot_dimension_numbers<[1], [0], [0], [1], [0, 0, 1, 1], [], []>} : vector<128x32xbf16>, vector<32x64xbf16>, vector<128x64xf32> -> vector<128x64xf32>
    %67 = vector.extract_strided_slice %66 {offsets = [0, 0], sizes = [128, 32], strides = [1, 1]} : vector<128x64xf32> to vector<128x32xf32>
    %c2_i32_28 = arith.constant 2 : i32
    %68 = tpu.dynamic_rotate %67 by %c2_i32_28 dim 0 : vector<128x32xf32>, i32 -> vector<128x32xf32>
    %cst_29 = arith.constant 0.000000e+00 : f32
    %69 = vector.shape_cast %21 : vector<128x1xi1> to vector<128x1xi1>
    %70 = vector.broadcast %69 : vector<128x1xi1> to vector<128x32xi1>
    %71 = vector.broadcast %cst_29 : f32 to vector<128x32xf32>
    %72 = arith.select %70, %68, %71 : vector<128x32xi1>, vector<128x32xf32>
    %73 = vector.extract_strided_slice %66 {offsets = [0, 32], sizes = [128, 32], strides = [1, 1]} : vector<128x64xf32> to vector<128x32xf32>
    %74 = arith.addf %72, %73 : vector<128x32xf32>
    %75 = vector.broadcast %64 : vector<1x32xf32> to vector<128x32xf32>
    %76 = arith.addf %74, %75 : vector<128x32xf32>
    %cst_30 = arith.constant 0.000000e+00 : f32
    %77 = vector.broadcast %cst_30 : f32 to vector<128x32xf32>
    %78 = arith.maximumf %76, %77 : vector<128x32xf32>
    %c0_31 = arith.constant 0 : index
    %c0_32 = arith.constant 0 : index
    %79 = vector.load %arg9[%c0_31, %c0_32] : memref<32x64xbf16, #tpu.memory_space<vmem>>, vector<32x64xbf16>
    %c0_33 = arith.constant 0 : index
    %c0_34 = arith.constant 0 : index
    %80 = vector.load %arg10[%c0_33, %c0_34] : memref<1x32xf32, #tpu.memory_space<vmem>>, vector<1x32xf32>
    %81 = arith.truncf %78 : vector<128x32xf32> to vector<128x32xbf16>
    %cst_35 = arith.constant dense<0.000000e+00> : vector<128x64xf32>
    %82 = tpu.matmul %81, %79, %cst_35 {dimension_numbers = #tpu.dot_dimension_numbers<[1], [0], [0], [1], [0, 0, 1, 1], [], []>} : vector<128x32xbf16>, vector<32x64xbf16>, vector<128x64xf32> -> vector<128x64xf32>
    %83 = vector.extract_strided_slice %82 {offsets = [0, 0], sizes = [128, 32], strides = [1, 1]} : vector<128x64xf32> to vector<128x32xf32>
    %c2_i32_36 = arith.constant 2 : i32
    %84 = tpu.dynamic_rotate %83 by %c2_i32_36 dim 0 : vector<128x32xf32>, i32 -> vector<128x32xf32>
    %cst_37 = arith.constant 0.000000e+00 : f32
    %85 = vector.shape_cast %21 : vector<128x1xi1> to vector<128x1xi1>
    %86 = vector.broadcast %85 : vector<128x1xi1> to vector<128x32xi1>
    %87 = vector.broadcast %cst_37 : f32 to vector<128x32xf32>
    %88 = arith.select %86, %84, %87 : vector<128x32xi1>, vector<128x32xf32>
    %89 = vector.extract_strided_slice %82 {offsets = [0, 32], sizes = [128, 32], strides = [1, 1]} : vector<128x64xf32> to vector<128x32xf32>
    %90 = arith.addf %88, %89 : vector<128x32xf32>
    %91 = vector.broadcast %80 : vector<1x32xf32> to vector<128x32xf32>
    %92 = arith.addf %90, %91 : vector<128x32xf32>
    %cst_38 = arith.constant 0.000000e+00 : f32
    %93 = vector.broadcast %cst_38 : f32 to vector<128x32xf32>
    %94 = arith.maximumf %92, %93 : vector<128x32xf32>
    %95 = arith.addf %94, %62 : vector<128x32xf32>
    %cst_39 = arith.constant 0.000000e+00 : f32
    %96 = vector.broadcast %cst_39 : f32 to vector<128x32xf32>
    %97 = arith.maximumf %95, %96 : vector<128x32xf32>
    %c0_40 = arith.constant 0 : index
    %c0_41 = arith.constant 0 : index
    %98 = vector.load %arg11[%c0_40, %c0_41] : memref<32x64xbf16, #tpu.memory_space<vmem>>, vector<32x64xbf16>
    %c0_42 = arith.constant 0 : index
    %c0_43 = arith.constant 0 : index
    %99 = vector.load %arg12[%c0_42, %c0_43] : memref<1x32xf32, #tpu.memory_space<vmem>>, vector<1x32xf32>
    %100 = arith.truncf %97 : vector<128x32xf32> to vector<128x32xbf16>
    %cst_44 = arith.constant dense<0.000000e+00> : vector<128x64xf32>
    %101 = tpu.matmul %100, %98, %cst_44 {dimension_numbers = #tpu.dot_dimension_numbers<[1], [0], [0], [1], [0, 0, 1, 1], [], []>} : vector<128x32xbf16>, vector<32x64xbf16>, vector<128x64xf32> -> vector<128x64xf32>
    %102 = vector.extract_strided_slice %101 {offsets = [0, 0], sizes = [128, 32], strides = [1, 1]} : vector<128x64xf32> to vector<128x32xf32>
    %c4_i32_45 = arith.constant 4 : i32
    %103 = tpu.dynamic_rotate %102 by %c4_i32_45 dim 0 : vector<128x32xf32>, i32 -> vector<128x32xf32>
    %cst_46 = arith.constant 0.000000e+00 : f32
    %104 = vector.shape_cast %23 : vector<128x1xi1> to vector<128x1xi1>
    %105 = vector.broadcast %104 : vector<128x1xi1> to vector<128x32xi1>
    %106 = vector.broadcast %cst_46 : f32 to vector<128x32xf32>
    %107 = arith.select %105, %103, %106 : vector<128x32xi1>, vector<128x32xf32>
    %108 = vector.extract_strided_slice %101 {offsets = [0, 32], sizes = [128, 32], strides = [1, 1]} : vector<128x64xf32> to vector<128x32xf32>
    %109 = arith.addf %107, %108 : vector<128x32xf32>
    %110 = vector.broadcast %99 : vector<1x32xf32> to vector<128x32xf32>
    %111 = arith.addf %109, %110 : vector<128x32xf32>
    %cst_47 = arith.constant 0.000000e+00 : f32
    %112 = vector.broadcast %cst_47 : f32 to vector<128x32xf32>
    %113 = arith.maximumf %111, %112 : vector<128x32xf32>
    %c0_48 = arith.constant 0 : index
    %c0_49 = arith.constant 0 : index
    %114 = vector.load %arg13[%c0_48, %c0_49] : memref<32x64xbf16, #tpu.memory_space<vmem>>, vector<32x64xbf16>
    %c0_50 = arith.constant 0 : index
    %c0_51 = arith.constant 0 : index
    %115 = vector.load %arg14[%c0_50, %c0_51] : memref<1x32xf32, #tpu.memory_space<vmem>>, vector<1x32xf32>
    %116 = arith.truncf %113 : vector<128x32xf32> to vector<128x32xbf16>
    %cst_52 = arith.constant dense<0.000000e+00> : vector<128x64xf32>
    %117 = tpu.matmul %116, %114, %cst_52 {dimension_numbers = #tpu.dot_dimension_numbers<[1], [0], [0], [1], [0, 0, 1, 1], [], []>} : vector<128x32xbf16>, vector<32x64xbf16>, vector<128x64xf32> -> vector<128x64xf32>
    %118 = vector.extract_strided_slice %117 {offsets = [0, 0], sizes = [128, 32], strides = [1, 1]} : vector<128x64xf32> to vector<128x32xf32>
    %c4_i32_53 = arith.constant 4 : i32
    %119 = tpu.dynamic_rotate %118 by %c4_i32_53 dim 0 : vector<128x32xf32>, i32 -> vector<128x32xf32>
    %cst_54 = arith.constant 0.000000e+00 : f32
    %120 = vector.shape_cast %23 : vector<128x1xi1> to vector<128x1xi1>
    %121 = vector.broadcast %120 : vector<128x1xi1> to vector<128x32xi1>
    %122 = vector.broadcast %cst_54 : f32 to vector<128x32xf32>
    %123 = arith.select %121, %119, %122 : vector<128x32xi1>, vector<128x32xf32>
    %124 = vector.extract_strided_slice %117 {offsets = [0, 32], sizes = [128, 32], strides = [1, 1]} : vector<128x64xf32> to vector<128x32xf32>
    %125 = arith.addf %123, %124 : vector<128x32xf32>
    %126 = vector.broadcast %115 : vector<1x32xf32> to vector<128x32xf32>
    %127 = arith.addf %125, %126 : vector<128x32xf32>
    %cst_55 = arith.constant 0.000000e+00 : f32
    %128 = vector.broadcast %cst_55 : f32 to vector<128x32xf32>
    %129 = arith.maximumf %127, %128 : vector<128x32xf32>
    %130 = arith.addf %129, %97 : vector<128x32xf32>
    %cst_56 = arith.constant 0.000000e+00 : f32
    %131 = vector.broadcast %cst_56 : f32 to vector<128x32xf32>
    %132 = arith.maximumf %130, %131 : vector<128x32xf32>
    %c0_57 = arith.constant 0 : index
    %c0_58 = arith.constant 0 : index
    %133 = vector.load %arg15[%c0_57, %c0_58] : memref<1x32xbf16, #tpu.memory_space<vmem>>, vector<1x32xbf16>
    %c0_59 = arith.constant 0 : index
    %c0_60 = arith.constant 0 : index
    %134 = vector.load %arg16[%c0_59, %c0_60] : memref<1x1xf32, #tpu.memory_space<vmem>>, vector<1x1xf32>
    %135 = vector.shape_cast %132 : vector<128x32xf32> to vector<8x16x32xf32>
    %136 = vector.extract_strided_slice %135 {offsets = [0, 15, 0], sizes = [8, 1, 32], strides = [1, 1, 1]} : vector<8x16x32xf32> to vector<8x1x32xf32>
    %137 = vector.shape_cast %136 : vector<8x1x32xf32> to vector<8x32xf32>
    %138 = arith.truncf %137 : vector<8x32xf32> to vector<8x32xbf16>
    %cst_61 = arith.constant dense<0.000000e+00> : vector<1x8xf32>
    %139 = tpu.matmul %133, %138, %cst_61 {dimension_numbers = #tpu.dot_dimension_numbers<[1], [1], [0], [0], [0, 0, 1, 0], [], []>} : vector<1x32xbf16>, vector<8x32xbf16>, vector<1x8xf32> -> vector<1x8xf32>
    %140 = vector.broadcast %134 : vector<1x1xf32> to vector<1x8xf32>
    %141 = arith.addf %139, %140 : vector<1x8xf32>
    %142 = vector.shape_cast %141 : vector<1x8xf32> to vector<1x1x8xf32>
    %c0_62 = arith.constant 0 : index
    %c0_63 = arith.constant 0 : index
    %c0_64 = arith.constant 0 : index
    %143 = vector.load %arg17[%c0_62, %c0_63, %c0_64] : memref<1x1x8xf32, #tpu.memory_space<vmem>>, vector<1x1x8xf32>
    tpu.vector_store %arg17[%c0_62, %c0_63, %c0_64], %142 {strides = array<i32>} : memref<1x1x8xf32, #tpu.memory_space<vmem>>, vector<1x1x8xf32>,
    return
  }
  func.func @transform_0(%arg0: i32) -> (i32, i32) {
    %c0_i32 = arith.constant 0 : i32
    %c0_i32_0 = arith.constant 0 : i32
    return %arg0, %c0_i32 : i32, i32
  }
  func.func @transform_1(%arg0: i32) -> (i32, i32) {
    %c0_i32 = arith.constant 0 : i32
    %c0_i32_0 = arith.constant 0 : i32
    %c0_i32_1 = arith.constant 0 : i32
    return %c0_i32, %c0_i32_0 : i32, i32
  }
  func.func @transform_2(%arg0: i32) -> (i32, i32) {
    %c0_i32 = arith.constant 0 : i32
    %c0_i32_0 = arith.constant 0 : i32
    %c0_i32_1 = arith.constant 0 : i32
    return %c0_i32, %c0_i32_0 : i32, i32
  }
  func.func @transform_3(%arg0: i32) -> (i32, i32) {
    %c0_i32 = arith.constant 0 : i32
    %c0_i32_0 = arith.constant 0 : i32
    %c0_i32_1 = arith.constant 0 : i32
    return %c0_i32, %c0_i32_0 : i32, i32
  }
  func.func @transform_4(%arg0: i32) -> (i32, i32) {
    %c0_i32 = arith.constant 0 : i32
    %c0_i32_0 = arith.constant 0 : i32
    %c0_i32_1 = arith.constant 0 : i32
    return %c0_i32, %c0_i32_0 : i32, i32
  }
  func.func @transform_5(%arg0: i32) -> (i32, i32) {
    %c0_i32 = arith.constant 0 : i32
    %c0_i32_0 = arith.constant 0 : i32
    %c0_i32_1 = arith.constant 0 : i32
    return %c0_i32, %c0_i32_0 : i32, i32
  }
  func.func @transform_6(%arg0: i32) -> (i32, i32) {
    %c0_i32 = arith.constant 0 : i32
    %c0_i32_0 = arith.constant 0 : i32
    %c0_i32_1 = arith.constant 0 : i32
    return %c0_i32, %c0_i32_0 : i32, i32
  }
  func.func @transform_7(%arg0: i32) -> (i32, i32) {
    %c0_i32 = arith.constant 0 : i32
    %c0_i32_0 = arith.constant 0 : i32
    %c0_i32_1 = arith.constant 0 : i32
    return %c0_i32, %c0_i32_0 : i32, i32
  }
  func.func @transform_8(%arg0: i32) -> (i32, i32) {
    %c0_i32 = arith.constant 0 : i32
    %c0_i32_0 = arith.constant 0 : i32
    %c0_i32_1 = arith.constant 0 : i32
    return %c0_i32, %c0_i32_0 : i32, i32
  }
  func.func @transform_9(%arg0: i32) -> (i32, i32) {
    %c0_i32 = arith.constant 0 : i32
    %c0_i32_0 = arith.constant 0 : i32
    %c0_i32_1 = arith.constant 0 : i32
    return %c0_i32, %c0_i32_0 : i32, i32
  }
  func.func @transform_10(%arg0: i32) -> (i32, i32) {
    %c0_i32 = arith.constant 0 : i32
    %c0_i32_0 = arith.constant 0 : i32
    %c0_i32_1 = arith.constant 0 : i32
    return %c0_i32, %c0_i32_0 : i32, i32
  }
  func.func @transform_11(%arg0: i32) -> (i32, i32) {
    %c0_i32 = arith.constant 0 : i32
    %c0_i32_0 = arith.constant 0 : i32
    %c0_i32_1 = arith.constant 0 : i32
    return %c0_i32, %c0_i32_0 : i32, i32
  }
  func.func @transform_12(%arg0: i32) -> (i32, i32) {
    %c0_i32 = arith.constant 0 : i32
    %c0_i32_0 = arith.constant 0 : i32
    %c0_i32_1 = arith.constant 0 : i32
    return %c0_i32, %c0_i32_0 : i32, i32
  }
  func.func @transform_13(%arg0: i32) -> (i32, i32) {
    %c0_i32 = arith.constant 0 : i32
    %c0_i32_0 = arith.constant 0 : i32
    %c0_i32_1 = arith.constant 0 : i32
    return %c0_i32, %c0_i32_0 : i32, i32
  }
  func.func @transform_14(%arg0: i32) -> (i32, i32) {
    %c0_i32 = arith.constant 0 : i32
    %c0_i32_0 = arith.constant 0 : i32
    %c0_i32_1 = arith.constant 0 : i32
    return %c0_i32, %c0_i32_0 : i32, i32
  }
  func.func @transform_15(%arg0: i32) -> (i32, i32) {
    %c0_i32 = arith.constant 0 : i32
    %c0_i32_0 = arith.constant 0 : i32
    %c0_i32_1 = arith.constant 0 : i32
    return %c0_i32, %c0_i32_0 : i32, i32
  }
  func.func @transform_16(%arg0: i32) -> (i32, i32, i32) {
    %c0_i32 = arith.constant 0 : i32
    %c0_i32_0 = arith.constant 0 : i32
    %c0_i32_1 = arith.constant 0 : i32
    return %arg0, %c0_i32, %c0_i32_0 : i32, i32, i32
  }
}

</mosaic_0001>

<bundles_post_ra>
// kernel: tpu_custom_call.1
= control target key start
LH: loop header
LB: loop body
LE: loop exit
PB: predicated region body
PF: predicated region fallthrough
CT: control target
= control target key end

     0   :  { %s3568_s0 = inlined_call_operand.vmem [shape: f32[128,4], index: 0, kind: input, shape index: {}]   ;;  %s3569_s1 = inlined_call_operand.vmem [shape: bf16[4,96], index: 1, kind: input, shape index: {}]   ;;  %s3570_s2 = inlined_call_operand.vmem [shape: f32[1,32], index: 2, kind: input, shape index: {}]   ;;  %s3571_s3 = inlined_call_operand.vmem [shape: f32[1,32], index: 3, kind: input, shape index: {}]   ;;  %s3572_s4 = inlined_call_operand.vmem [shape: bf16[32,64], index: 4, kind: input, shape index: {}]   ;;  %s3573_s5 = inlined_call_operand.vmem [shape: f32[1,32], index: 5, kind: input, shape index: {}]   ;;  %s3574_s6 = inlined_call_operand.vmem [shape: bf16[32,64], index: 6, kind: input, shape index: {}]   ;;  %s3575_s7 = inlined_call_operand.vmem [shape: f32[1,32], index: 7, kind: input, shape index: {}]   ;;  %s3576_s8 = inlined_call_operand.vmem [shape: bf16[32,64], index: 8, kind: input, shape index: {}]   ;;  %s3577_s9 = inlined_call_operand.vmem [shape: f32[1,32], index: 9, kind: input, shape index: {}]   ;;  %s3578_s10 = inlined_call_operand.vmem [shape: bf16[32,64], index: 10, kind: input, shape index: {}]   ;;  %s3579_s11 = inlined_call_operand.vmem [shape: f32[1,32], index: 11, kind: input, shape index: {}]   ;;  %s3580_s12 = inlined_call_operand.vmem [shape: bf16[32,64], index: 12, kind: input, shape index: {}]   ;;  %s3581_s13 = inlined_call_operand.vmem [shape: f32[1,32], index: 13, kind: input, shape index: {}]   ;;  %s3582_s14 = inlined_call_operand.vmem [shape: bf16[1,32], index: 14, kind: input, shape index: {}]   ;;  %s3583_s15 = inlined_call_operand.<no memory space> [shape: f32[1,1], index: 15, kind: input, shape index: {}]   ;;  %s3584_s16 = inlined_call_operand.hbm [shape: f32[1,1,8], index: 16, kind: output, shape index: {}]  }
   0x1   :  { %3593 = sst [smem:[#allocation6_spill]] %s3568_s0  ;;  %v21_v0 = vstv %s3583_s15 }
   0x2   :  { %22 = vst [vmem:[#allocation2] sm:$0x1] %v21_v0 }
   0x3   :  { %v330_v1 = vld [vmem:[%s3569_s1] sm:$0x3]  ;;  %vm365_vm0 = vcmask 1041408   ;;  %s3594_s27 = sld [smem:[#allocation6_spill]]  ;;  %vm340_vm1 = vcmask 31744  }
   0x4   :  { %v367_v4 = vsel %vm365_vm0, %v330_v1, 0 }
   0x5   :  { %376 = vmatpush.bf16.msra.mxu0 %v367_v4  ;;  %2270 = vmatpush.bf16.msra.mxu2 %v367_v4 }
   0x9   :  { %v57_v2 = vld [vmem:[%s3594_s27] sm:$0xff]  ;;  %v58_v3 = vld [vmem:[%s3594_s27 + $0x8] sm:$0xff]  ;;  %v67_v6 = vld [vmem:[%s3594_s27 + $0x50] sm:$0xff] }
   0xa   :  { %v332_v5 = vpack.c.bf16 %v58_v3, %v57_v2  ;;  %v68_v7 = vld [vmem:[%s3594_s27 + $0x58] sm:$0xff] }
   0xb   :  { %v337_v8 = vpack.c.bf16 %v68_v7, %v67_v6 }
   0xc   :  { %2171 = vmatmul.msk.bf16.vlgmr.msra.gmra.mxu0 %vm340_vm1, %v332_v5 }
   0xd   :  { %2176 = vmatmul.msk.bf16.vlgmr.msra.gmra.mxu2 %vm340_vm1, %v337_v8 }
   0xe   :  { %23 = vsyncpa [#allocation4], 0  ;;  %v59_v9 = vld [vmem:[%s3594_s27 + $0x10] sm:$0xff]  ;;  %v60_v10 = vld [vmem:[%s3594_s27 + $0x18] sm:$0xff]  ;;  %s2311_s25 = smov 96   ;;  %s2312_s28 = smov 64   ;;  %v73_v46 = vlaneseq }
   0xf   :  { %v69_v11 = vld [vmem:[%s3594_s27 + $0x60] sm:$0xff]  ;;  %v70_v12 = vld [vmem:[%s3594_s27 + $0x68] sm:$0xff]  ;;  %v333_v13 = vpack.c.bf16 %v60_v10, %v59_v9  ;;  %v71_v17 = vld [vmem:[%s3594_s27 + $0x70] sm:$0xff]  ;;  %vm661_vm5 = vcmask 261120   ;;  %s2314_s15 = smov [#allocation3]   ;;  %s2162_s18 = sshll.u32 %s3584_s16, 4  ;;  %s2163_s18 = int_to_ptr.hbm [resolvable:$true] %s2162_s18 }
  0x10   :  { %v338_v14 = vpack.c.bf16 %v70_v12, %v69_v11  ;;  %v61_v15 = vld [vmem:[%s3594_s27 + $0x20] sm:$0xff]  ;;  %v62_v16 = vld [vmem:[%s3594_s27 + $0x28] sm:$0xff]  ;;  %v72_v18 = vld [vmem:[%s3594_s27 + $0x78] sm:$0xff]  ;;  %v2536_v47 = vshrl.u32 %v73_v46, 7 }
  0x11   :  { %v334_v19 = vpack.c.bf16 %v62_v16, %v61_v15  ;;  %v339_v20 = vpack.c.bf16 %v72_v18, %v71_v17  ;;  %v63_v21 = vld [vmem:[%s3594_s27 + $0x30] sm:$0xff]  ;;  %v64_v22 = vld [vmem:[%s3594_s27 + $0x38] sm:$0xff]  ;;  %v65_v24 = vld [vmem:[%s3594_s27 + $0x40] sm:$0xff] }
  0x12   :  { %v335_v23 = vpack.c.bf16 %v64_v22, %v63_v21  ;;  %v66_v25 = vld [vmem:[%s3594_s27 + $0x48] sm:$0xff]  ;;  %v2278_v41 = vld [vmem:[%s3571_s3] ss:$0 sm:$0xff]  ;;  %v2540_v49 = vand.u32 15, %v2536_v47  ;;  %v84_v51 = vadd.s32 80, %v2536_v47  ;;  %vm456_vm2 = vcmp.lt.s32.totalorder %v2536_v47, 1 }
  0x13   :  { %v336_v26 = vpack.c.bf16 %v66_v25, %v65_v24  ;;  %v2261_v44 = vld [vmem:[%s3572_s4 + $0x8] sm:$0xff]  ;;  %v2260_v45 = vld [vmem:[%s3572_s4] sm:$0xff]  ;;  %v76_v6 = vadd.s32 16, %v2536_v47  ;;  %v86_v11 = vadd.s32 96, %v2536_v47  ;;  %vm1108_vm12 = vcmp.lt.s32.totalorder %v2536_v47, 2 }
  0x14   :  { %692 = vmatpush.bf16.msra.mxu1 %v2261_v44  ;;  %2271 = vmatpush.bf16.msra.mxu3 %v2261_v44  ;;  %vm282_vm3 = vcmp.ge.s32.totalorder %v2540_v49, 1  ;;  %v2551_v55 = vand.u32 15, %v84_v51  ;;  %v2560_v62 = vld [vmem:[%s3570_s2] ss:$0 sm:$0xff]  ;;  %vm298_vm13 = vcmp.ge.s32.totalorder %v2540_v49, 2  ;;  %s2160_s2 = sshll.u32 %s2314_s15, 4  ;;  %s2161_s2 = int_to_ptr.vmem [resolvable:$true] %s2160_s2 }
  0x15   :  { %v2578_v15 = vand.u32 15, %v76_v6  ;;  %v2584_v21 = vand.u32 15, %v86_v11 }
  0x16   :  { %vm292_vm4 = vcmp.ge.s32.totalorder %v2551_v55, 1 }
  0x17   :  { %vm284_vm6 = vcmp.ge.s32.totalorder %v2578_v15, 1  ;;  %vm294_vm7 = vcmp.ge.s32.totalorder %v2584_v21, 1  ;;  %vm300_vm14 = vcmp.ge.s32.totalorder %v2578_v15, 2 }
  0x18   :  { %693 = vmatpush.bf16.msra.mxu1 %v2260_v45  ;;  %2272 = vmatpush.bf16.msra.mxu3 %v2260_v45 }
  0x1c   :  { %2172 = vmatmul.msk.bf16.gmra.mxu0 %vm340_vm1, %v333_v13 }
  0x1d   :  { %2177 = vmatmul.msk.bf16.gmra.mxu2 %vm340_vm1, %v338_v14 }
  0x2c   :  { %2173 = vmatmul.msk.bf16.gmra.mxu0 %vm340_vm1, %v334_v19 }
  0x2d   :  { %2178 = vmatmul.msk.bf16.gmra.mxu2 %vm340_vm1, %v339_v20 }
  0x3c   :  { %2174 = vmatmul.msk.bf16.gmra.mxu0 %vm340_vm1, %v335_v23 }
  0x4c   :  { %2175 = vmatmul.msk.bf16.gmra.mxu0 %vm340_vm1, %v336_v26 }
  0x89   :  { %v2462_v27 = vpop.f32.mrf.mxu0 }
  0x8a   :  { %537 = vrot.lane.b32.xlu1 %v2462_v27, %s2311_s25  ;;  %v440_v50 = vrot.slane %v2462_v27, 7 }
  0x90   :  { %v2466_v28 = vpop.f32.mrf.mxu2 }
  0x91   :  { %557 = vrot.lane.b32.xlu0 %v2466_v28, %s2311_s25  ;;  %v2470_v29 = vpop.f32.mrf.mxu0  ;;  %v450_v59 = vrot.slane %v2466_v28, 7 }
  0x92   :  { %539 = vrot.lane.b32.xlu1 %v2470_v29, %s2311_s25  ;;  %v441_v56 = vrot.slane %v2470_v29, 7 }
  0x94   :  { %v471_v1 = vsel %vm456_vm2, %v440_v50, %v441_v56 }
  0x98   :  { %v2474_v30 = vpop.f32.mrf.mxu2 }
  0x99   :  { %559 = vrot.lane.b32.xlu0 %v2474_v30, %s2311_s25  ;;  %v2478_v31 = vpop.f32.mrf.mxu0  ;;  %v451_v4 = vrot.slane %v2474_v30, 7 }
  0x9a   :  { %v442_v16 = vrot.slane %v2478_v31, 7 }
  0x9b   :  { %v461_v14 = vsel %vm456_vm2, %v450_v59, %v451_v4 }
  0x9c   :  { %v470_v25 = vsel %vm456_vm2, %v441_v56, %v442_v16 }
  0x9d   :  { %v507_v46 = vsel %vm284_vm6, %v470_v25, 0.0 }
  0xa0   :  { %v2480_v32 = vpop.f32.mrf.mxu2 }
  0xa1   :  { %561 = vrot.lane.b32.xlu2 %v2480_v32, %s2311_s25  ;;  %541 = vrot.lane.b32.xlu0 %v2478_v31, %s2311_s25  ;;  %v2486_v33 = vpop.f32.mrf.mxu0  ;;  %v452_v22 = vrot.slane %v2480_v32, 7 }
  0xa2   :  { %543 = vrot.lane.b32.xlu1 %v2486_v33, %s2311_s25  ;;  %v443_v26 = vrot.slane %v2486_v33, 7 }
  0xa3   :  { %v460_v51 = vsel %vm456_vm2, %v451_v4, %v452_v22 }
  0xa8   :  { %v2490_v34 = vpop.f32.mrf.mxu2 }
  0xa9   :  { %563 = vrot.lane.b32.xlu2 %v2490_v34, %s2311_s25  ;;  %v2494_v35 = vpop.f32.mrf.mxu0 }
  0xaa   :  { %545 = vrot.lane.b32.xlu1 %v2494_v35, %s2311_s25 }
  0xb0   :  { %v2498_v36 = vpop.f32.mrf.mxu2 }
  0xb1   :  { %565 = vrot.lane.b32.xlu2 %v2498_v36, %s2311_s25  ;;  %v2502_v37 = vpop.f32.mrf.mxu0 }
  0xb8   :  { %v2504_v38 = vpop.f32.mrf.mxu2 }
  0xb9   :  { %567 = vrot.lane.b32.xlu0 %v2504_v38, %s2311_s25  ;;  %547 = vrot.lane.b32.xlu2 %v2502_v37, %s2311_s25  ;;  %v2510_v39 = vpop.f32.mrf.mxu0  ;;  %v455_v48 = vrot.slane %v2504_v38, 7 }
  0xbb   :  { %v472_v53 = vsel %vm456_vm2, %v455_v48, %v440_v50  ;;  %v78_v50 = vadd.s32 32, %v2536_v47 }
  0xbc   :  { %v505_v58 = vsel %vm282_vm3, %v472_v53, 0.0 }
  0xc1   :  { %549 = vrot.lane.b32.xlu0 %v2510_v39, %s2311_s25  ;;  %v2514_v40 = vpop.f32.mrf.mxu0 }
  0xc2   :  { %551 = vrot.lane.b32.xlu1 %v2514_v40, %s2311_s25 }
  0xc9   :  { %v2521_v42 = vpop.f32.mrf.mxu0 }
  0xca   :  { %421 = vrot.lane.b32.xlu1 %v2278_v41, %s2312_s28  ;;  %553 = vrot.lane.b32.xlu2 %v2521_v42, %s2311_s25  ;;  %v453_v41 = vrot.slane %v2490_v34, 7 }
  0xcc   :  { %v459_v53 = vsel %vm456_vm2, %v452_v22, %v453_v41 }
  0xd1   :  { %v2526_v43 = vpop.f32.mrf.mxu0 }
  0xd2   :  { %555 = vrot.lane.b32.xlu0 %v2526_v43, %s2311_s25  ;;  %v449_v54 = vrot.slane %v2526_v43, 7 }
  0xd4   :  { %v462_v63 = vsel %vm456_vm2, %v449_v54, %v450_v59  ;;  %v469_v59 = vsel %vm456_vm2, %v442_v16, %v443_v26 }
  0xd5   :  { %v515_v5 = vsel %vm292_vm4, %v462_v63, 0.0 }
  0xfb   :  { %v562_v57 = vpop.permute.xlu2 %561 }
  0xfc   :  { %v538_v52 = vpop.permute.xlu1 %537 }
  0xfd   :  { %v585_v60 = vadd.f32 %v538_v52, %v505_v58 }
  0xff   :  { %v604_v2 = vadd.f32 %v2560_v62, %v585_v60 }
 0x101   :  { %v620_v9 = vmax.f32 %v604_v2, 0.0  ;;  %v444_v2 = vrot.slane %v2494_v35, 7 }
 0x103   :  { %v558_v61 = vpop.permute.xlu0 %557  ;;  %v564_v12 = vpop.permute.xlu2 %563 }
 0x104   :  { %v540_v0 = vpop.permute.xlu1 %539  ;;  %v595_v7 = vadd.f32 %v558_v61, %v515_v5  ;;  %v598_v60 = vadd.f32 %v564_v12, %v459_v53  ;;  %v445_v12 = vrot.slane %v2502_v37, 7 }
 0x105   :  { %v586_v3 = vadd.f32 %v540_v0, %v471_v1  ;;  %v517_v0 = vsel %vm294_vm7, %v460_v51, 0.0  ;;  %v2606_v1 = vand.u32 15, %v78_v50 }
 0x106   :  { %v614_v17 = vadd.f32 %v2560_v62, %v595_v7  ;;  %v617_v5 = vadd.f32 %v2560_v62, %v598_v60  ;;  %v467_v22 = vsel %vm456_vm2, %v444_v2, %v445_v12 }
 0x107   :  { %v605_v8 = vadd.f32 %v2560_v62, %v586_v3  ;;  %v597_v3 = vadd.f32 %v562_v57, %v517_v0  ;;  %vm286_vm8 = vcmp.ge.s32.totalorder %v2606_v1, 1  ;;  %vm302_vm15 = vcmp.ge.s32.totalorder %v2606_v1, 2 }
 0x108   :  { %v630_v23 = vmax.f32 %v614_v17, 0.0  ;;  %v633_v57 = vmax.f32 %v617_v5, 0.0  ;;  %v454_v17 = vrot.slane %v2498_v36, 7 }
 0x109   :  { %v621_v10 = vmax.f32 %v605_v8, 0.0  ;;  %v616_v8 = vadd.f32 %v2560_v62, %v597_v3  ;;  %v447_v3 = vrot.slane %v2514_v40, 7 }
 0x10a   :  { %v458_v25 = vsel %vm456_vm2, %v453_v41, %v454_v17  ;;  %v457_v53 = vsel %vm456_vm2, %v454_v17, %v455_v48 }
 0x10b   :  { %v560_v13 = vpop.permute.xlu0 %559  ;;  %v641_v19 = vpack.c.bf16 %v621_v10, %v620_v9  ;;  %v566_v56 = vpop.permute.xlu2 %565  ;;  %v88_v9 = vadd.s32 112, %v2536_v47  ;;  %v468_v10 = vsel %vm456_vm2, %v443_v26, %v444_v2 }
 0x10c   :  { %v596_v18 = vadd.f32 %v560_v13, %v461_v14  ;;  %v509_v16 = vsel %vm286_vm8, %v468_v10, 0.0  ;;  %v82_v10 = vadd.s32 64, %v2536_v47 }
 0x10d   :  { %2187 = vmatmul.msk.bf16.vlgmr.msra.gmra.mxu1 %vm661_vm5, %v641_v19  ;;  %v2621_v19 = vand.u32 15, %v88_v9 }
 0x10e   :  { %v615_v20 = vadd.f32 %v2560_v62, %v596_v18  ;;  %v632_v18 = vmax.f32 %v616_v8, 0.0 }
 0x10f   :  { %vm296_vm9 = vcmp.ge.s32.totalorder %v2621_v19, 1 }
 0x110   :  { %v631_v24 = vmax.f32 %v615_v20, 0.0 }
 0x112   :  { %v646_v44 = vpack.c.bf16 %v631_v24, %v630_v23  ;;  %v647_v24 = vpack.c.bf16 %v633_v57, %v632_v18  ;;  %v448_v57 = vrot.slane %v2521_v42, 7 }
 0x113   :  { %v542_v45 = vpop.permute.xlu0 %541  ;;  %v548_v14 = vpop.permute.xlu2 %547 }
 0x114   :  { %v587_v52 = vadd.f32 %v542_v45, %v507_v46  ;;  %2192 = vmatmul.msk.bf16.vlgmr.msra.gmra.mxu3 %vm661_vm5, %v646_v44  ;;  %v544_v58 = vpop.permute.xlu1 %543  ;;  %v590_v23 = vadd.f32 %v548_v14, %v467_v22  ;;  %v519_v45 = vsel %vm296_vm9, %v458_v25, 0.0  ;;  %v80_v46 = vadd.s32 48, %v2536_v47 }
 0x115   :  { %v588_v63 = vadd.f32 %v544_v58, %v469_v59  ;;  %v599_v50 = vadd.f32 %v566_v56, %v519_v45  ;;  %v446_v59 = vrot.slane %v2510_v39, 7  ;;  %v2657_v14 = vand.u32 15, %v82_v10 }
 0x116   :  { %v606_v61 = vadd.f32 %v2560_v62, %v587_v52  ;;  %v609_v44 = vadd.f32 %v2560_v62, %v590_v23  ;;  %v2638_v58 = vand.u32 15, %v80_v46  ;;  %v464_v22 = vsel %vm456_vm2, %v447_v3, %v448_v57 }
 0x117   :  { %v607_v4 = vadd.f32 %v2560_v62, %v588_v63  ;;  %v618_v60 = vadd.f32 %v2560_v62, %v599_v50  ;;  %v466_v48 = vsel %vm456_vm2, %v445_v12, %v446_v59  ;;  %v465_v9 = vsel %vm456_vm2, %v446_v59, %v447_v3 }
 0x118   :  { %v622_v6 = vmax.f32 %v606_v61, 0.0  ;;  %v625_v52 = vmax.f32 %v609_v44, 0.0  ;;  %vm288_vm10 = vcmp.ge.s32.totalorder %v2638_v58, 1  ;;  %vm290_vm11 = vcmp.ge.s32.totalorder %v2657_v14, 1 }
 0x119   :  { %v623_v7 = vmax.f32 %v607_v4, 0.0  ;;  %v634_v56 = vmax.f32 %v618_v60, 0.0  ;;  %v513_v25 = vsel %vm290_vm11, %v464_v22, 0.0  ;;  %v463_v45 = vsel %vm456_vm2, %v448_v57, %v449_v54 }
 0x11a   :  { %vm304_vm0 = vcmp.ge.s32.totalorder %v2638_v58, 2  ;;  %vm306_vm1 = vcmp.ge.s32.totalorder %v2657_v14, 2 }
 0x11b   :  { %v642_v11 = vpack.c.bf16 %v623_v7, %v622_v6  ;;  %v511_v6 = vsel %vm288_vm10, %v466_v48, 0.0 }
 0x11c   :  { %v546_v13 = vpop.permute.xlu1 %545 }
 0x11d   :  { %2188 = vmatmul.msk.bf16.gmra.mxu1 %vm661_vm5, %v642_v11  ;;  %v589_v20 = vadd.f32 %v546_v13, %v509_v16 }
 0x11f   :  { %v608_v26 = vadd.f32 %v2560_v62, %v589_v20 }
 0x121   :  { %v624_v51 = vmax.f32 %v608_v26, 0.0 }
 0x123   :  { %v643_v63 = vpack.c.bf16 %v625_v52, %v624_v51 }
 0x124   :  { %2193 = vmatmul.msk.bf16.gmra.mxu3 %vm661_vm5, %v647_v24  ;;  %v554_v24 = vpop.permute.xlu2 %553 }
 0x125   :  { %v593_v26 = vadd.f32 %v554_v24, %v513_v25 }
 0x127   :  { %v612_v46 = vadd.f32 %v2560_v62, %v593_v26 }
 0x129   :  { %v628_v52 = vmax.f32 %v612_v46, 0.0 }
 0x12b   :  { %v568_v41 = vpop.permute.xlu0 %567 }
 0x12c   :  { %v600_v61 = vadd.f32 %v568_v41, %v457_v53 }
 0x12d   :  { %2189 = vmatmul.msk.bf16.gmra.mxu1 %vm661_vm5, %v643_v63 }
 0x12e   :  { %v619_v0 = vadd.f32 %v2560_v62, %v600_v61 }
 0x130   :  { %v635_v2 = vmax.f32 %v619_v0, 0.0 }
 0x132   :  { %v648_v4 = vpack.c.bf16 %v635_v2, %v634_v56 }
 0x133   :  { %v550_v5 = vpop.permute.xlu0 %549 }
 0x134   :  { %v591_v7 = vadd.f32 %v550_v5, %v511_v6  ;;  %2194 = vmatmul.msk.bf16.gmra.mxu3 %vm661_vm5, %v648_v4  ;;  %v552_v8 = vpop.permute.xlu1 %551 }
 0x135   :  { %v592_v13 = vadd.f32 %v552_v8, %v465_v9 }
 0x136   :  { %v610_v11 = vadd.f32 %v2560_v62, %v591_v7 }
 0x137   :  { %v611_v12 = vadd.f32 %v2560_v62, %v592_v13 }
 0x138   :  { %v626_v16 = vmax.f32 %v610_v11, 0.0 }
 0x139   :  { %v627_v17 = vmax.f32 %v611_v12, 0.0 }
 0x13b   :  { %v644_v18 = vpack.c.bf16 %v627_v17, %v626_v16 }
 0x13c   :  { %v2659_v20 = vpop.permute.xlu1 %421 }
 0x13d   :  { %2190 = vmatmul.msk.bf16.gmra.mxu1 %vm661_vm5, %v644_v18  ;;  %v424_v23 = vadd.f32 %v2659_v20, %v2462_v27  ;;  %v425_v59 = vadd.f32 %v2659_v20, %v2470_v29  ;;  %v427_v63 = vadd.f32 %v2659_v20, %v2486_v33  ;;  %v428_v33 = vadd.f32 %v2659_v20, %v2494_v35 }
 0x13e   :  { %v429_v35 = vadd.f32 %v2659_v20, %v2502_v37  ;;  %v430_v18 = vadd.f32 %v2659_v20, %v2510_v39 }
 0x13f   :  { %914 = vrot.lane.b32.xlu1 %v424_v23, %s2312_s28 }
 0x144   :  { %v556_v44 = vpop.permute.xlu0 %555 }
 0x145   :  { %v594_v50 = vadd.f32 %v556_v44, %v463_v45  ;;  %v431_v44 = vadd.f32 %v2659_v20, %v2514_v40 }
 0x147   :  { %v613_v51 = vadd.f32 %v2560_v62, %v594_v50  ;;  %v426_v62 = vadd.f32 %v2659_v20, %v2478_v31 }
 0x149   :  { %v629_v27 = vmax.f32 %v613_v51, 0.0  ;;  %v432_v51 = vadd.f32 %v2659_v20, %v2521_v42  ;;  %v433_v42 = vadd.f32 %v2659_v20, %v2526_v43  ;;  %v435_v43 = vadd.f32 %v2659_v20, %v2474_v30  ;;  %v2263_v30 = vld [vmem:[%s3574_s6 + $0x8] sm:$0xff] }
 0x14a   :  { %1049 = vmatpush.bf16.msrb.mxu2 %v2263_v30 }
 0x14b   :  { %v645_v53 = vpack.c.bf16 %v629_v27, %v628_v52 }
 0x14d   :  { %2191 = vmatmul.msk.bf16.gmra.mxu1 %vm661_vm5, %v645_v53 }
 0x18a   :  { %v2677_v41 = vpop.f32.mrf.mxu1 }
 0x18b   :  { %799 = vrot.lane.b32.xlu2 %v2677_v41, %s2311_s25 }
 0x192   :  { %v2683_v60 = vpop.f32.mrf.mxu1 }
 0x193   :  { %916 = vrot.lane.b32.xlu2 %v425_v59, %s2312_s28  ;;  %801 = vrot.lane.b32.xlu0 %v2683_v60, %s2311_s25  ;;  %v434_v59 = vadd.f32 %v2659_v20, %v2466_v28  ;;  %v436_v28 = vadd.f32 %v2659_v20, %v2480_v32  ;;  %v439_v32 = vadd.f32 %v2659_v20, %v2504_v38 }
 0x197   :  { %v2688_v54 = vpop.f32.mrf.mxu3 }
 0x19a   :  { %v2692_v61 = vpop.f32.mrf.mxu1 }
 0x19b   :  { %918 = vrot.lane.b32.xlu2 %v426_v62, %s2312_s28  ;;  %803 = vrot.lane.b32.xlu0 %v2692_v61, %s2311_s25  ;;  %v737_v56 = vrot.slane %v2692_v61, 7  ;;  %v437_v62 = vadd.f32 %v2659_v20, %v2490_v34  ;;  %v2262_v34 = vld [vmem:[%s3574_s6] sm:$0xff] }
 0x19c   :  { %1050 = vmatpush.bf16.msrb.mxu2 %v2262_v34 }
 0x19f   :  { %v2697_v29 = vpop.f32.mrf.mxu3 }
 0x1a0   :  { %v746_v3 = vrot.slane %v2697_v29, 7 }
 0x1a2   :  { %v702_v0 = vpop.f32.mrf.mxu1 }
 0x1a3   :  { %v738_v2 = vrot.slane %v702_v0, 7  ;;  %805 = vrot.lane.b32.xlu1 %v702_v0, %s2311_s25  ;;  %920 = vrot.lane.b32.xlu0 %v427_v63, %s2312_s28  ;;  %v438_v63 = vadd.f32 %v2659_v20, %v2498_v36  ;;  %v735_v36 = vrot.slane %v2677_v41, 7  ;;  %v736_v20 = vrot.slane %v2683_v60, 7 }
 0x1a5   :  { %v2708_v31 = vsel %vm456_vm2, %v737_v56, %v738_v2  ;;  %v765_v41 = vsel %vm456_vm2, %v735_v36, %v736_v20  ;;  %v764_v60 = vsel %vm456_vm2, %v736_v20, %v737_v56 }
 0x1a7   :  { %v725_v48 = vpop.f32.mrf.mxu3 }
 0x1a8   :  { %v747_v4 = vrot.slane %v725_v48, 7 }
 0x1aa   :  { %v2717_v5 = vsel %vm456_vm2, %v746_v3, %v747_v4  ;;  %v705_v6 = vpop.f32.mrf.mxu1 }
 0x1ab   :  { %v739_v7 = vrot.slane %v705_v6, 7  ;;  %807 = vrot.lane.b32.xlu1 %v705_v6, %s2311_s25  ;;  %922 = vrot.lane.b32.xlu0 %v428_v33, %s2312_s28 }
 0x1ad   :  { %v2723_v8 = vsel %vm456_vm2, %v738_v2, %v739_v7 }
 0x1ae   :  { %v771_v30 = vsel %vm286_vm8, %v2723_v8, 0.0  ;;  %vm316_vm8 = vcmp.ge.s32.totalorder %v2578_v15, 4 }
 0x1af   :  { %v727_v9 = vpop.f32.mrf.mxu3 }
 0x1b0   :  { %v748_v10 = vrot.slane %v727_v9, 7 }
 0x1b2   :  { %v2729_v11 = vsel %vm456_vm2, %v747_v4, %v748_v10  ;;  %v707_v13 = vpop.f32.mrf.mxu1  ;;  %v2822_v4 = vld [vmem:[%s3573_s5] ss:$0 sm:$0xff] }
 0x1b3   :  { %v740_v12 = vrot.slane %v707_v13, 7  ;;  %924 = vrot.lane.b32.xlu1 %v429_v35, %s2312_s28  ;;  %809 = vrot.lane.b32.xlu2 %v707_v13, %s2311_s25  ;;  %v915_v35 = vpop.permute.xlu1 %914 }
 0x1b5   :  { %v2735_v57 = vsel %vm456_vm2, %v739_v7, %v740_v12 }
 0x1b7   :  { %v730_v16 = vpop.f32.mrf.mxu3 }
 0x1b8   :  { %v749_v17 = vrot.slane %v730_v16, 7 }
 0x1ba   :  { %v2741_v37 = vsel %vm456_vm2, %v748_v10, %v749_v17  ;;  %v710_v22 = vpop.f32.mrf.mxu1 }
 0x1bb   :  { %v741_v23 = vrot.slane %v710_v22, 7  ;;  %926 = vrot.lane.b32.xlu1 %v430_v18, %s2312_s28  ;;  %811 = vrot.lane.b32.xlu2 %v710_v22, %s2311_s25  ;;  %v769_v18 = vsel %vm284_vm6, %v764_v60, 0.0  ;;  %vm1695_vm6 = vcmp.lt.s32.totalorder %v2536_v47, 4 }
 0x1bd   :  { %v2747_v24 = vsel %vm456_vm2, %v740_v12, %v741_v23 }
 0x1bf   :  { %v732_v25 = vpop.f32.mrf.mxu3 }
 0x1c0   :  { %v750_v26 = vrot.slane %v732_v25, 7 }
 0x1c2   :  { %v2753_v39 = vsel %vm456_vm2, %v749_v17, %v750_v26  ;;  %v712_v45 = vpop.f32.mrf.mxu1  ;;  %v766_v0 = vsel %vm456_vm2, %v750_v26, %v735_v36 }
 0x1c3   :  { %v742_v46 = vrot.slane %v712_v45, 7  ;;  %928 = vrot.lane.b32.xlu2 %v431_v44, %s2312_s28  ;;  %813 = vrot.lane.b32.xlu0 %v712_v45, %s2311_s25 }
 0x1c5   :  { %v2759_v50 = vsel %vm456_vm2, %v741_v23, %v742_v46 }
 0x1ca   :  { %v2763_v52 = vpop.f32.mrf.mxu1 }
 0x1cb   :  { %v743_v40 = vrot.slane %v2763_v52, 7  ;;  %930 = vrot.lane.b32.xlu2 %v432_v51, %s2312_s28  ;;  %815 = vrot.lane.b32.xlu0 %v2763_v52, %s2311_s25 }
 0x1cd   :  { %v2773_v27 = vsel %vm456_vm2, %v742_v46, %v743_v40 }
 0x1d2   :  { %v2775_v53 = vpop.f32.mrf.mxu1 }
 0x1d3   :  { %817 = vrot.lane.b32.xlu1 %v2775_v53, %s2311_s25  ;;  %821 = vrot.lane.b32.xlu2 %v2697_v29, %s2311_s25 }
 0x1d4   :  { %932 = vrot.lane.b32.xlu0 %v433_v42, %s2312_s28 }
 0x1db   :  { %819 = vrot.lane.b32.xlu1 %v2688_v54, %s2311_s25  ;;  %823 = vrot.lane.b32.xlu2 %v725_v48, %s2311_s25  ;;  %v767_v48 = vsel %vm282_vm3, %v766_v0, 0.0  ;;  %vm310_vm3 = vcmp.ge.s32.totalorder %v2584_v21, 2 }
 0x1dc   :  { %934 = vrot.lane.b32.xlu0 %v434_v59, %s2312_s28 }
 0x1e3   :  { %936 = vrot.lane.b32.xlu1 %v435_v43, %s2312_s28  ;;  %940 = vrot.lane.b32.xlu2 %v437_v62, %s2312_s28 }
 0x1e4   :  { %825 = vrot.lane.b32.xlu0 %v727_v9, %s2311_s25 }
 0x1e5   :  { %v800_v2 = vpop.permute.xlu2 %799 }
 0x1e6   :  { %v847_v38 = vadd.f32 %v800_v2, %v767_v48 }
 0x1e8   :  { %v866_v33 = vadd.f32 %v2822_v4, %v847_v38 }
 0x1ea   :  { %v882_v7 = vmax.f32 %v866_v33, 0.0 }
 0x1eb   :  { %938 = vrot.lane.b32.xlu1 %v436_v28, %s2312_s28  ;;  %942 = vrot.lane.b32.xlu2 %v438_v63, %s2312_s28 }
 0x1ec   :  { %827 = vrot.lane.b32.xlu0 %v730_v16, %s2311_s25  ;;  %v2829_v12 = vadd.f32 %v915_v35, %v882_v7  ;;  %v773_v35 = vsel %vm288_vm10, %v2747_v24, 0.0  ;;  %vm320_vm10 = vcmp.ge.s32.totalorder %v2638_v58, 4 }
 0x1ed   :  { %v917_v13 = vpop.permute.xlu2 %916 }
 0x1ee   :  { %v978_v23 = vmax.f32 %v2829_v12, 0.0 }
 0x1f3   :  { %829 = vrot.lane.b32.xlu1 %v732_v25, %s2311_s25 }
 0x1f4   :  { %944 = vrot.lane.b32.xlu0 %v439_v32, %s2312_s28 }
 0x1f5   :  { %v919_v56 = vpop.permute.xlu2 %918 }
 0x205   :  { %v802_v6 = vpop.permute.xlu0 %801 }
 0x206   :  { %v848_v9 = vadd.f32 %v802_v6, %v765_v41 }
 0x208   :  { %v867_v10 = vadd.f32 %v2822_v4, %v848_v9 }
 0x20a   :  { %v883_v16 = vmax.f32 %v867_v10, 0.0 }
 0x20c   :  { %v2835_v17 = vadd.f32 %v917_v13, %v883_v16 }
 0x20d   :  { %v804_v22 = vpop.permute.xlu0 %803  ;;  %v810_v62 = vpop.permute.xlu2 %809 }
 0x20e   :  { %v979_v25 = vmax.f32 %v2835_v17, 0.0  ;;  %v849_v26 = vadd.f32 %v804_v22, %v769_v18  ;;  %v852_v32 = vadd.f32 %v810_v62, %v2735_v57 }
 0x210   :  { %v999_v44 = vpack.c.bf16 %v979_v25, %v978_v23  ;;  %v868_v61 = vadd.f32 %v2822_v4, %v849_v26  ;;  %v871_v48 = vadd.f32 %v2822_v4, %v852_v32 }
 0x212   :  { %2203 = vmatmul.msk.bf16.vlgmr.msrb.gmra.mxu2 %vm661_vm5, %v999_v44  ;;  %v884_v46 = vmax.f32 %v868_v61, 0.0  ;;  %v887_v33 = vmax.f32 %v871_v48, 0.0 }
 0x214   :  { %v2849_v59 = vadd.f32 %v919_v56, %v884_v46 }
 0x215   :  { %v806_v45 = vpop.permute.xlu1 %805  ;;  %v921_v28 = vpop.permute.xlu0 %920 }
 0x216   :  { %v850_v51 = vadd.f32 %v806_v45, %v2708_v31  ;;  %v980_v36 = vmax.f32 %v2849_v59, 0.0  ;;  %v812_v9 = vpop.permute.xlu2 %811 }
 0x217   :  { %v853_v13 = vadd.f32 %v812_v9, %v773_v35 }
 0x218   :  { %v869_v42 = vadd.f32 %v2822_v4, %v850_v51 }
 0x219   :  { %v872_v60 = vadd.f32 %v2822_v4, %v853_v13 }
 0x21a   :  { %v885_v43 = vmax.f32 %v869_v42, 0.0  ;;  %v775_v42 = vsel %vm290_vm11, %v2773_v27, 0.0  ;;  %vm322_vm11 = vcmp.ge.s32.totalorder %v2657_v14, 4 }
 0x21b   :  { %v888_v61 = vmax.f32 %v872_v60, 0.0 }
 0x21c   :  { %v2851_v63 = vadd.f32 %v921_v28, %v885_v43 }
 0x21d   :  { %v808_v34 = vpop.permute.xlu1 %807  ;;  %v923_v41 = vpop.permute.xlu0 %922 }
 0x21e   :  { %v981_v31 = vmax.f32 %v2851_v63, 0.0  ;;  %v851_v0 = vadd.f32 %v808_v34, %v771_v30  ;;  %v929_v26 = vpop.permute.xlu2 %928  ;;  %v744_v30 = vrot.slane %v2775_v53, 7 }
 0x220   :  { %v1000_v2 = vpack.c.bf16 %v981_v31, %v980_v36  ;;  %v870_v38 = vadd.f32 %v2822_v4, %v851_v0  ;;  %v757_v27 = vsel %vm456_vm2, %v743_v40, %v744_v30 }
 0x222   :  { %2204 = vmatmul.msk.bf16.gmra.mxu2 %vm661_vm5, %v1000_v2  ;;  %v886_v20 = vmax.f32 %v870_v38, 0.0 }
 0x224   :  { %v2868_v6 = vadd.f32 %v923_v41, %v886_v20 }
 0x225   :  { %v925_v8 = vpop.permute.xlu1 %924 }
 0x226   :  { %v2866_v57 = vadd.f32 %v925_v8, %v887_v33  ;;  %v982_v10 = vmax.f32 %v2868_v6, 0.0  ;;  %v931_v34 = vpop.permute.xlu2 %930  ;;  %v745_v8 = vrot.slane %v2688_v54, 7 }
 0x228   :  { %v983_v7 = vmax.f32 %v2866_v57, 0.0  ;;  %v756_v41 = vsel %vm456_vm2, %v744_v30, %v745_v8  ;;  %v755_v52 = vsel %vm456_vm2, %v745_v8, %v746_v3  ;;  %v779_v30 = vsel %vm294_vm7, %v2717_v5, 0.0 }
 0x229   :  { %v777_v54 = vsel %vm292_vm4, %v756_v41, 0.0  ;;  %vm308_vm2 = vcmp.ge.s32.totalorder %v2551_v55, 2  ;;  %vm312_vm4 = vcmp.ge.s32.totalorder %v2621_v19, 2  ;;  %vm314_vm7 = vcmp.ge.s32.totalorder %v2540_v49, 4 }
 0x22a   :  { %v1001_v16 = vpack.c.bf16 %v983_v7, %v982_v10 }
 0x22d   :  { %v927_v44 = vpop.permute.xlu1 %926 }
 0x22e   :  { %v2883_v45 = vadd.f32 %v927_v44, %v888_v61  ;;  %v822_v9 = vpop.permute.xlu2 %821 }
 0x22f   :  { %v858_v13 = vadd.f32 %v822_v9, %v755_v52 }
 0x230   :  { %v984_v43 = vmax.f32 %v2883_v45, 0.0 }
 0x231   :  { %v877_v29 = vadd.f32 %v2822_v4, %v858_v13 }
 0x232   :  { %2205 = vmatmul.msk.bf16.gmra.mxu2 %vm661_vm5, %v1001_v16 }
 0x235   :  { %v814_v18 = vpop.permute.xlu0 %813 }
 0x236   :  { %v854_v22 = vadd.f32 %v814_v18, %v2759_v50 }
 0x238   :  { %v873_v56 = vadd.f32 %v2822_v4, %v854_v22 }
 0x23a   :  { %v889_v24 = vmax.f32 %v873_v56, 0.0  ;;  %v893_v56 = vmax.f32 %v877_v29, 0.0 }
 0x23c   :  { %v2885_v46 = vadd.f32 %v929_v26, %v889_v24 }
 0x23d   :  { %v816_v51 = vpop.permute.xlu0 %815 }
 0x23e   :  { %v985_v62 = vmax.f32 %v2885_v46, 0.0  ;;  %v855_v50 = vadd.f32 %v816_v51, %v775_v42  ;;  %v824_v42 = vpop.permute.xlu2 %823 }
 0x240   :  { %v1002_v28 = vpack.c.bf16 %v985_v62, %v984_v43  ;;  %v874_v32 = vadd.f32 %v2822_v4, %v855_v50 }
 0x242   :  { %2206 = vmatmul.msk.bf16.gmra.mxu2 %vm661_vm5, %v1002_v28  ;;  %v890_v2 = vmax.f32 %v874_v32, 0.0 }
 0x244   :  { %v2905_v33 = vadd.f32 %v931_v34, %v890_v2  ;;  %v859_v34 = vadd.f32 %v824_v42, %v779_v30 }
 0x245   :  { %v818_v0 = vpop.permute.xlu1 %817 }
 0x246   :  { %v856_v48 = vadd.f32 %v818_v0, %v757_v27  ;;  %v933_v38 = vpop.permute.xlu0 %932  ;;  %v986_v16 = vmax.f32 %v2905_v33, 0.0 }
 0x248   :  { %v875_v20 = vadd.f32 %v2822_v4, %v856_v48  ;;  %v878_v48 = vadd.f32 %v2822_v4, %v859_v34 }
 0x24a   :  { %v891_v53 = vmax.f32 %v875_v20, 0.0  ;;  %v894_v20 = vmax.f32 %v878_v48, 0.0 }
 0x24c   :  { %v2909_v35 = vadd.f32 %v933_v38, %v891_v53  ;;  %v941_v53 = vpop.permute.xlu2 %940 }
 0x24d   :  { %v820_v40 = vpop.permute.xlu1 %819 }
 0x24e   :  { %v3592_v60 = vmax.f32 %v2909_v35, 0.0  ;;  %v857_v18 = vadd.f32 %v820_v40, %v777_v54  ;;  %v935_v26 = vpop.permute.xlu0 %934  ;;  %v781_v54 = vsel %vm296_vm9, %v2741_v37, 0.0  ;;  %vm318_vm9 = vcmp.ge.s32.totalorder %v2606_v1, 4 }
 0x250   :  { %v1003_v22 = vpack.c.bf16 %v3592_v60, %v986_v16  ;;  %v876_v3 = vadd.f32 %v2822_v4, %v857_v18 }
 0x252   :  { %2207 = vmatmul.msk.bf16.gmra.mxu2 %vm661_vm5, %v1003_v22  ;;  %v892_v61 = vmax.f32 %v876_v3, 0.0 }
 0x254   :  { %v2928_v51 = vadd.f32 %v935_v26, %v892_v61  ;;  %v943_v37 = vpop.permute.xlu2 %942 }
 0x255   :  { %v937_v44 = vpop.permute.xlu1 %936 }
 0x256   :  { %v2926_v24 = vadd.f32 %v937_v44, %v893_v56  ;;  %v826_v50 = vpop.permute.xlu0 %825  ;;  %v3591_v32 = vmax.f32 %v2928_v51, 0.0 }
 0x257   :  { %v860_v0 = vadd.f32 %v826_v50, %v2729_v11 }
 0x258   :  { %v3590_v28 = vmax.f32 %v2926_v24, 0.0 }
 0x259   :  { %v879_v38 = vadd.f32 %v2822_v4, %v860_v0 }
 0x25a   :  { %v1004_v2 = vpack.c.bf16 %v3590_v28, %v3591_v32 }
 0x25b   :  { %v895_v8 = vmax.f32 %v879_v38, 0.0 }
 0x25d   :  { %v939_v27 = vpop.permute.xlu1 %938  ;;  %v2945_v9 = vadd.f32 %v941_v53, %v895_v8 }
 0x25e   :  { %v2943_v5 = vadd.f32 %v939_v27, %v894_v20  ;;  %v828_v11 = vpop.permute.xlu0 %827 }
 0x25f   :  { %v3588_v13 = vmax.f32 %v2945_v9, 0.0  ;;  %v861_v18 = vadd.f32 %v828_v11, %v781_v54 }
 0x260   :  { %v3589_v52 = vmax.f32 %v2943_v5, 0.0 }
 0x261   :  { %v880_v29 = vadd.f32 %v2822_v4, %v861_v18 }
 0x262   :  { %2208 = vmatmul.msk.bf16.gmra.mxu2 %vm661_vm5, %v1004_v2  ;;  %v1005_v22 = vpack.c.bf16 %v3588_v13, %v3589_v52 }
 0x265   :  { %v830_v41 = vpop.permute.xlu1 %829 }
 0x266   :  { %v862_v40 = vadd.f32 %v830_v41, %v2753_v39  ;;  %v896_v39 = vmax.f32 %v880_v29, 0.0  ;;  %v945_v44 = vpop.permute.xlu0 %944 }
 0x268   :  { %v881_v26 = vadd.f32 %v2822_v4, %v862_v40  ;;  %v2962_v56 = vadd.f32 %v943_v37, %v896_v39 }
 0x26a   :  { %v897_v3 = vmax.f32 %v881_v26, 0.0  ;;  %v3587_v50 = vmax.f32 %v2962_v56, 0.0 }
 0x26c   :  { %v2960_v61 = vadd.f32 %v945_v44, %v897_v3 }
 0x26e   :  { %v3586_v42 = vmax.f32 %v2960_v61, 0.0 }
 0x270   :  { %v1006_v30 = vpack.c.bf16 %v3586_v42, %v3587_v50 }
 0x272   :  { %2209 = vmatmul.msk.bf16.gmra.mxu2 %vm661_vm5, %v1005_v22 }
 0x282   :  { %2210 = vmatmul.msk.bf16.gmra.mxu2 %vm661_vm5, %v1006_v30 }
 0x295   :  { %v2971_v4 = vpop.f32.mrf.mxu2 }
 0x296   :  { %1189 = vrot.lane.b32.xlu1 %v2971_v4, %s2311_s25  ;;  %v1092_v0 = vrot.slane %v2971_v4, 6 }
 0x29d   :  { %v1054_v34 = vpop.f32.mrf.mxu2 }
 0x29e   :  { %v1093_v27 = vrot.slane %v1054_v34, 6  ;;  %1191 = vrot.lane.b32.xlu2 %v1054_v34, %s2311_s25 }
 0x2a0   :  { %v1123_v2 = vsel %vm1108_vm12, %v1092_v0, %v1093_v27 }
 0x2a5   :  { %v1057_v48 = vpop.f32.mrf.mxu2 }
 0x2a6   :  { %v1094_v38 = vrot.slane %v1057_v48, 6  ;;  %1193 = vrot.lane.b32.xlu0 %v1057_v48, %s2311_s25 }
 0x2a8   :  { %v2985_v8 = vsel %vm1108_vm12, %v1093_v27, %v1094_v38 }
 0x2ad   :  { %v1059_v20 = vpop.f32.mrf.mxu2 }
 0x2ae   :  { %v1095_v53 = vrot.slane %v1059_v20, 6  ;;  %1195 = vrot.lane.b32.xlu1 %v1059_v20, %s2311_s25 }
 0x2b0   :  { %v2990_v41 = vsel %vm1108_vm12, %v1094_v38, %v1095_v53 }
 0x2b5   :  { %v1062_v11 = vpop.f32.mrf.mxu2 }
 0x2b6   :  { %v1096_v40 = vrot.slane %v1062_v11, 6  ;;  %1197 = vrot.lane.b32.xlu2 %v1062_v11, %s2311_s25 }
 0x2b8   :  { %v2995_v54 = vsel %vm1108_vm12, %v1095_v53, %v1096_v40 }
 0x2bd   :  { %v1064_v18 = vpop.f32.mrf.mxu2 }
 0x2be   :  { %v1097_v22 = vrot.slane %v1064_v18, 6  ;;  %1199 = vrot.lane.b32.xlu0 %v1064_v18, %s2311_s25 }
 0x2c0   :  { %v3000_v26 = vsel %vm1108_vm12, %v1096_v40, %v1097_v22 }
 0x2c5   :  { %v1067_v29 = vpop.f32.mrf.mxu2 }
 0x2c6   :  { %v1098_v3 = vrot.slane %v1067_v29, 6  ;;  %1201 = vrot.lane.b32.xlu1 %v1067_v29, %s2311_s25 }
 0x2c8   :  { %v3005_v39 = vsel %vm1108_vm12, %v1097_v22, %v1098_v3 }
 0x2cd   :  { %v1069_v44 = vpop.f32.mrf.mxu2 }
 0x2ce   :  { %v1099_v37 = vrot.slane %v1069_v44, 6  ;;  %1203 = vrot.lane.b32.xlu2 %v1069_v44, %s2311_s25  ;;  %v2265_v44 = vld [vmem:[%s3576_s8 + $0x8] sm:$0xff] }
 0x2cf   :  { %1343 = vmatpush.bf16.msrb.mxu3 %v2265_v44 }
 0x2d0   :  { %v3010_v30 = vsel %vm1108_vm12, %v1098_v3, %v1099_v37 }
 0x2d5   :  { %v1072_v34 = vpop.f32.mrf.mxu2 }
 0x2d6   :  { %v1100_v27 = vrot.slane %v1072_v34, 6  ;;  %1205 = vrot.lane.b32.xlu0 %v1072_v34, %s2311_s25 }
 0x2d8   :  { %v3015_v48 = vsel %vm1108_vm12, %v1099_v37, %v1100_v27 }
 0x2dd   :  { %v1074_v38 = vpop.f32.mrf.mxu2 }
 0x2de   :  { %v1101_v20 = vrot.slane %v1074_v38, 6  ;;  %1207 = vrot.lane.b32.xlu1 %v1074_v38, %s2311_s25 }
 0x2e0   :  { %v3020_v53 = vsel %vm1108_vm12, %v1100_v27, %v1101_v20  ;;  %v2264_v27 = vld [vmem:[%s3576_s8] sm:$0xff] }
 0x2e1   :  { %1344 = vmatpush.bf16.msrb.mxu3 %v2264_v27  ;;  %v3056_v27 = vld [vmem:[%s3575_s7] ss:$0 sm:$0xff] }
 0x2e5   :  { %v1077_v11 = vpop.f32.mrf.mxu2 }
 0x2e6   :  { %v1102_v40 = vrot.slane %v1077_v11, 6  ;;  %1209 = vrot.lane.b32.xlu2 %v1077_v11, %s2311_s25 }
 0x2e8   :  { %v3025_v18 = vsel %vm1108_vm12, %v1101_v20, %v1102_v40 }
 0x2ed   :  { %v1079_v22 = vpop.f32.mrf.mxu2 }
 0x2ee   :  { %v1103_v29 = vrot.slane %v1079_v22, 6  ;;  %1211 = vrot.lane.b32.xlu0 %v1079_v22, %s2311_s25 }
 0x2f0   :  { %v3030_v3 = vsel %vm1108_vm12, %v1102_v40, %v1103_v29 }
 0x2f5   :  { %v1082_v37 = vpop.f32.mrf.mxu2 }
 0x2f6   :  { %v1104_v34 = vrot.slane %v1082_v37, 6  ;;  %1213 = vrot.lane.b32.xlu1 %v1082_v37, %s2311_s25 }
 0x2f8   :  { %v3041_v38 = vsel %vm1108_vm12, %v1103_v29, %v1104_v34  ;;  %v1192_v42 = vpop.permute.xlu2 %1191 }
 0x2fd   :  { %v1084_v20 = vpop.f32.mrf.mxu2 }
 0x2fe   :  { %v1105_v11 = vrot.slane %v1084_v20, 6  ;;  %1215 = vrot.lane.b32.xlu2 %v1084_v20, %s2311_s25  ;;  %v1238_v20 = vadd.f32 %v1192_v42, %v1123_v2 }
 0x300   :  { %v3046_v40 = vsel %vm1108_vm12, %v1104_v34, %v1105_v11  ;;  %v1257_v42 = vadd.f32 %v3056_v27, %v1238_v20 }
 0x302   :  { %v1273_v28 = vmax.f32 %v1257_v42, 0.0 }
 0x305   :  { %v1087_v22 = vpop.f32.mrf.mxu2 }
 0x306   :  { %v1106_v37 = vrot.slane %v1087_v22, 6  ;;  %1217 = vrot.lane.b32.xlu0 %v1087_v22, %s2311_s25 }
 0x308   :  { %v3051_v44 = vsel %vm1108_vm12, %v1105_v11, %v1106_v37  ;;  %v1190_v50 = vpop.permute.xlu1 %1189 }
 0x30d   :  { %v1089_v29 = vpop.f32.mrf.mxu2 }
 0x30e   :  { %v1107_v34 = vrot.slane %v1089_v29, 6  ;;  %1219 = vrot.lane.b32.xlu1 %v1089_v29, %s2311_s25 }
 0x310   :  { %v1124_v22 = vsel %vm1108_vm12, %v1107_v34, %v1092_v0  ;;  %v3066_v11 = vsel %vm1108_vm12, %v1106_v37, %v1107_v34  ;;  %v1159_v0 = vsel %vm300_vm14, %v2985_v8, 0.0  ;;  %v1198_v42 = vpop.permute.xlu2 %1197 }
 0x311   :  { %v1157_v13 = vsel %vm298_vm13, %v1124_v22, 0.0 }
 0x312   :  { %v1237_v2 = vadd.f32 %v1190_v50, %v1157_v13 }
 0x314   :  { %v1256_v52 = vadd.f32 %v3056_v27, %v1237_v2 }
 0x316   :  { %v1272_v29 = vmax.f32 %v1256_v52, 0.0 }
 0x318   :  { %v1293_v32 = vpack.c.bf16 %v1273_v28, %v1272_v29  ;;  %v1194_v4 = vpop.permute.xlu0 %1193 }
 0x319   :  { %v1239_v37 = vadd.f32 %v1194_v4, %v1159_v0 }
 0x31a   :  { %2219 = vmatmul.msk.bf16.vlgmr.msrb.gmra.mxu3 %vm661_vm5, %v1293_v32  ;;  %v1161_v32 = vsel %vm302_vm15, %v2995_v54, 0.0  ;;  %v1163_v54 = vsel %vm304_vm0, %v3005_v39, 0.0 }
 0x31b   :  { %v1258_v22 = vadd.f32 %v3056_v27, %v1239_v37  ;;  %v1241_v8 = vadd.f32 %v1198_v42, %v1161_v32 }
 0x31d   :  { %v1274_v20 = vmax.f32 %v1258_v22, 0.0  ;;  %v1260_v29 = vadd.f32 %v3056_v27, %v1241_v8  ;;  %v1165_v8 = vsel %vm306_vm1, %v3015_v48, 0.0  ;;  %v1167_v48 = vsel %vm308_vm2, %v3025_v18, 0.0 }
 0x31e   :  { %v1169_v18 = vsel %vm310_vm3, %v3041_v38, 0.0 }
 0x31f   :  { %v1276_v37 = vmax.f32 %v1260_v29, 0.0 }
 0x320   :  { %v1196_v34 = vpop.permute.xlu1 %1195 }
 0x321   :  { %v1240_v13 = vadd.f32 %v1196_v34, %v2990_v41 }
 0x323   :  { %v1259_v50 = vadd.f32 %v3056_v27, %v1240_v13 }
 0x325   :  { %v1275_v52 = vmax.f32 %v1259_v50, 0.0 }
 0x327   :  { %v1294_v28 = vpack.c.bf16 %v1275_v52, %v1274_v20 }
 0x328   :  { %v1204_v4 = vpop.permute.xlu2 %1203 }
 0x329   :  { %v1244_v34 = vadd.f32 %v1204_v4, %v3010_v30 }
 0x32a   :  { %2220 = vmatmul.msk.bf16.gmra.mxu3 %vm661_vm5, %v1294_v28 }
 0x32b   :  { %v1263_v20 = vadd.f32 %v3056_v27, %v1244_v34 }
 0x32d   :  { %v1279_v28 = vmax.f32 %v1263_v20, 0.0 }
 0x330   :  { %v1200_v2 = vpop.permute.xlu0 %1199 }
 0x331   :  { %v1242_v41 = vadd.f32 %v1200_v2, %v3000_v26 }
 0x333   :  { %v1261_v0 = vadd.f32 %v3056_v27, %v1242_v41 }
 0x335   :  { %v1277_v22 = vmax.f32 %v1261_v0, 0.0 }
 0x337   :  { %v1295_v13 = vpack.c.bf16 %v1277_v22, %v1276_v37 }
 0x338   :  { %v1202_v50 = vpop.permute.xlu1 %1201 }
 0x339   :  { %v1243_v52 = vadd.f32 %v1202_v50, %v1163_v54 }
 0x33a   :  { %2221 = vmatmul.msk.bf16.gmra.mxu3 %vm661_vm5, %v1295_v13 }
 0x33b   :  { %v1262_v26 = vadd.f32 %v3056_v27, %v1243_v52 }
 0x33d   :  { %v1278_v42 = vmax.f32 %v1262_v26, 0.0 }
 0x33f   :  { %v1296_v32 = vpack.c.bf16 %v1279_v28, %v1278_v42 }
 0x340   :  { %v1210_v22 = vpop.permute.xlu2 %1209 }
 0x341   :  { %v1247_v13 = vadd.f32 %v1210_v22, %v1167_v48 }
 0x343   :  { %v1266_v54 = vadd.f32 %v3056_v27, %v1247_v13 }
 0x345   :  { %v1282_v26 = vmax.f32 %v1266_v54, 0.0 }
 0x348   :  { %v1206_v30 = vpop.permute.xlu0 %1205 }
 0x349   :  { %v1245_v39 = vadd.f32 %v1206_v30, %v1165_v8 }
 0x34a   :  { %2222 = vmatmul.msk.bf16.gmra.mxu3 %vm661_vm5, %v1296_v32 }
 0x34b   :  { %v1264_v29 = vadd.f32 %v3056_v27, %v1245_v39 }
 0x34d   :  { %v1280_v0 = vmax.f32 %v1264_v29, 0.0 }
 0x350   :  { %v1208_v2 = vpop.permute.xlu1 %1207 }
 0x351   :  { %v1246_v41 = vadd.f32 %v1208_v2, %v3020_v53 }
 0x353   :  { %v1265_v4 = vadd.f32 %v3056_v27, %v1246_v41 }
 0x355   :  { %v1281_v37 = vmax.f32 %v1265_v4, 0.0  ;;  %v1171_v4 = vsel %vm312_vm4, %v3051_v44, 0.0 }
 0x357   :  { %v1297_v34 = vpack.c.bf16 %v1281_v37, %v1280_v0 }
 0x358   :  { %v1216_v20 = vpop.permute.xlu2 %1215 }
 0x359   :  { %v1250_v28 = vadd.f32 %v1216_v20, %v3046_v40 }
 0x35a   :  { %2223 = vmatmul.msk.bf16.gmra.mxu3 %vm661_vm5, %v1297_v34 }
 0x35b   :  { %v1269_v8 = vadd.f32 %v3056_v27, %v1250_v28 }
 0x35d   :  { %v1285_v2 = vmax.f32 %v1269_v8, 0.0 }
 0x360   :  { %v1212_v50 = vpop.permute.xlu0 %1211 }
 0x361   :  { %v1248_v53 = vadd.f32 %v1212_v50, %v3030_v3 }
 0x363   :  { %v1267_v52 = vadd.f32 %v3056_v27, %v1248_v53 }
 0x365   :  { %v1283_v42 = vmax.f32 %v1267_v52, 0.0 }
 0x367   :  { %v1298_v32 = vpack.c.bf16 %v1283_v42, %v1282_v26 }
 0x368   :  { %v1214_v30 = vpop.permute.xlu1 %1213 }
 0x369   :  { %v1249_v39 = vadd.f32 %v1214_v30, %v1169_v18 }
 0x36a   :  { %2224 = vmatmul.msk.bf16.gmra.mxu3 %vm661_vm5, %v1298_v32 }
 0x36b   :  { %v1268_v3 = vadd.f32 %v3056_v27, %v1249_v39 }
 0x36d   :  { %v1284_v29 = vmax.f32 %v1268_v3, 0.0 }
 0x36f   :  { %v1299_v41 = vpack.c.bf16 %v1285_v2, %v1284_v29 }
 0x378   :  { %v1218_v40 = vpop.permute.xlu0 %1217 }
 0x379   :  { %v1251_v38 = vadd.f32 %v1218_v40, %v1171_v4 }
 0x37a   :  { %2225 = vmatmul.msk.bf16.gmra.mxu3 %vm661_vm5, %v1299_v41 }
 0x37b   :  { %v1270_v37 = vadd.f32 %v3056_v27, %v1251_v38 }
 0x37d   :  { %v1286_v48 = vmax.f32 %v1270_v37, 0.0 }
 0x380   :  { %v1220_v0 = vpop.permute.xlu1 %1219 }
 0x381   :  { %v1252_v34 = vadd.f32 %v1220_v0, %v3066_v11 }
 0x383   :  { %v1271_v22 = vadd.f32 %v3056_v27, %v1252_v34 }
 0x385   :  { %v1287_v13 = vmax.f32 %v1271_v22, 0.0 }
 0x387   :  { %v1300_v50 = vpack.c.bf16 %v1287_v13, %v1286_v48 }
 0x38a   :  { %2226 = vmatmul.msk.bf16.gmra.mxu3 %vm661_vm5, %v1300_v50 }
 0x39d   :  { %v3129_v54 = vpop.f32.mrf.mxu3 }
 0x39e   :  { %1450 = vrot.lane.b32.xlu2 %v3129_v54, %s2311_s25  ;;  %v1386_v44 = vrot.slane %v3129_v54, 6 }
 0x3a5   :  { %v1348_v53 = vpop.f32.mrf.mxu3 }
 0x3a6   :  { %v1387_v20 = vrot.slane %v1348_v53, 6  ;;  %1452 = vrot.lane.b32.xlu0 %v1348_v53, %s2311_s25 }
 0x3a8   :  { %v3139_v27 = vsel %vm1108_vm12, %v1386_v44, %v1387_v20 }
 0x3ad   :  { %v1351_v11 = vpop.f32.mrf.mxu3 }
 0x3ae   :  { %v1388_v52 = vrot.slane %v1351_v11, 6  ;;  %1454 = vrot.lane.b32.xlu1 %v1351_v11, %s2311_s25 }
 0x3b0   :  { %v3144_v26 = vsel %vm1108_vm12, %v1387_v20, %v1388_v52 }
 0x3b1   :  { %v1420_v60 = vsel %vm300_vm14, %v3144_v26, 0.0  ;;  %vm328_vm14 = vcmp.ge.s32.totalorder %v2621_v19, 4 }
 0x3b5   :  { %v1353_v28 = vpop.f32.mrf.mxu3 }
 0x3b6   :  { %v1389_v42 = vrot.slane %v1353_v28, 6  ;;  %1456 = vrot.lane.b32.xlu2 %v1353_v28, %s2311_s25 }
 0x3b8   :  { %v3149_v32 = vsel %vm1108_vm12, %v1388_v52, %v1389_v42 }
 0x3bd   :  { %v1356_v30 = vpop.f32.mrf.mxu3 }
 0x3be   :  { %v1390_v18 = vrot.slane %v1356_v30, 6  ;;  %1458 = vrot.lane.b32.xlu0 %v1356_v30, %s2311_s25 }
 0x3c0   :  { %v3154_v8 = vsel %vm1108_vm12, %v1389_v42, %v1390_v18 }
 0x3c5   :  { %v1358_v39 = vpop.f32.mrf.mxu3 }
 0x3c6   :  { %v1391_v3 = vrot.slane %v1358_v39, 6  ;;  %1460 = vrot.lane.b32.xlu1 %v1358_v39, %s2311_s25  ;;  %v2267_v39 = vld [vmem:[%s3578_s10 + $0x8] sm:$0xff] }
 0x3c7   :  { %1636 = vmatpush.bf16.msrb.mxu0 %v2267_v39 }
 0x3c8   :  { %v3159_v2 = vsel %vm1108_vm12, %v1390_v18, %v1391_v3 }
 0x3cd   :  { %v1361_v29 = vpop.f32.mrf.mxu3 }
 0x3ce   :  { %v1392_v41 = vrot.slane %v1361_v29, 6  ;;  %1462 = vrot.lane.b32.xlu2 %v1361_v29, %s2311_s25  ;;  %v2266_v29 = vld [vmem:[%s3578_s10] sm:$0xff] }
 0x3cf   :  { %1637 = vmatpush.bf16.msrb.mxu0 %v2266_v29 }
 0x3d0   :  { %v3164_v40 = vsel %vm1108_vm12, %v1391_v3, %v1392_v41 }
 0x3d5   :  { %v1363_v4 = vpop.f32.mrf.mxu3 }
 0x3d6   :  { %v1393_v38 = vrot.slane %v1363_v4, 6  ;;  %1464 = vrot.lane.b32.xlu0 %v1363_v4, %s2311_s25 }
 0x3d8   :  { %v3169_v0 = vsel %vm1108_vm12, %v1392_v41, %v1393_v38 }
 0x3dd   :  { %v1366_v37 = vpop.f32.mrf.mxu3 }
 0x3de   :  { %v1394_v34 = vrot.slane %v1366_v37, 6  ;;  %1466 = vrot.lane.b32.xlu1 %v1366_v37, %s2311_s25 }
 0x3e0   :  { %v3174_v22 = vsel %vm1108_vm12, %v1393_v38, %v1394_v34 }
 0x3e5   :  { %v1368_v48 = vpop.f32.mrf.mxu3 }
 0x3e6   :  { %v1395_v13 = vrot.slane %v1368_v48, 6  ;;  %1468 = vrot.lane.b32.xlu2 %v1368_v48, %s2311_s25 }
 0x3e8   :  { %v3179_v50 = vsel %vm1108_vm12, %v1394_v34, %v1395_v13 }
 0x3ed   :  { %v1371_v53 = vpop.f32.mrf.mxu3 }
 0x3ee   :  { %v1396_v20 = vrot.slane %v1371_v53, 6  ;;  %1470 = vrot.lane.b32.xlu0 %v1371_v53, %s2311_s25 }
 0x3f0   :  { %v3184_v11 = vsel %vm1108_vm12, %v1395_v13, %v1396_v20 }
 0x3f5   :  { %v1373_v52 = vpop.f32.mrf.mxu3 }
 0x3f6   :  { %v1397_v28 = vrot.slane %v1373_v52, 6  ;;  %1472 = vrot.lane.b32.xlu1 %v1373_v52, %s2311_s25 }
 0x3f8   :  { %v3189_v42 = vsel %vm1108_vm12, %v1396_v20, %v1397_v28  ;;  %v1451_v20 = vpop.permute.xlu2 %1450 }
 0x3fd   :  { %v1376_v30 = vpop.f32.mrf.mxu3 }
 0x3fe   :  { %v1398_v18 = vrot.slane %v1376_v30, 6  ;;  %1474 = vrot.lane.b32.xlu2 %v1376_v30, %s2311_s25 }
 0x400   :  { %v3197_v3 = vsel %vm1108_vm12, %v1397_v28, %v1398_v18 }
 0x405   :  { %v1378_v41 = vpop.f32.mrf.mxu3 }
 0x406   :  { %v1399_v4 = vrot.slane %v1378_v41, 6  ;;  %1476 = vrot.lane.b32.xlu0 %v1378_v41, %s2311_s25 }
 0x408   :  { %v3205_v38 = vsel %vm1108_vm12, %v1398_v18, %v1399_v4  ;;  %v3224_v18 = vld [vmem:[%s3577_s9] ss:$0 sm:$0xff] }
 0x40d   :  { %v1381_v37 = vpop.f32.mrf.mxu3 }
 0x40e   :  { %v1400_v34 = vrot.slane %v1381_v37, 6  ;;  %1478 = vrot.lane.b32.xlu1 %v1381_v37, %s2311_s25 }
 0x410   :  { %v3210_v48 = vsel %vm1108_vm12, %v1399_v4, %v1400_v34 }
 0x415   :  { %v1383_v13 = vpop.f32.mrf.mxu3 }
 0x416   :  { %v1401_v53 = vrot.slane %v1383_v13, 6  ;;  %1480 = vrot.lane.b32.xlu2 %v1383_v13, %s2311_s25  ;;  %v1457_v13 = vpop.permute.xlu2 %1456 }
 0x418   :  { %v1417_v52 = vsel %vm1108_vm12, %v1401_v53, %v1386_v44  ;;  %v1453_v28 = vpop.permute.xlu0 %1452  ;;  %v3219_v30 = vsel %vm1108_vm12, %v1400_v34, %v1401_v53  ;;  %vm324_vm12 = vcmp.ge.s32.totalorder %v2551_v55, 4 }
 0x419   :  { %v1418_v39 = vsel %vm298_vm13, %v1417_v52, 0.0  ;;  %v1499_v29 = vadd.f32 %v1453_v28, %v3139_v27  ;;  %v1501_v28 = vadd.f32 %v1457_v13, %v3149_v32  ;;  %v1422_v32 = vsel %vm302_vm15, %v3154_v8, 0.0 }
 0x41a   :  { %v1498_v41 = vadd.f32 %v1451_v20, %v1418_v39  ;;  %vm326_vm13 = vcmp.ge.s32.totalorder %v2584_v21, 4  ;;  %vm2114_vm15 = vcmask 1041409  }
 0x41b   :  { %v1518_v54 = vadd.f32 %v3224_v18, %v1499_v29 }
 0x41c   :  { %v1517_v44 = vadd.f32 %v3224_v18, %v1498_v41 }
 0x41d   :  { %v1534_v4 = vmax.f32 %v1518_v54, 0.0 }
 0x41e   :  { %v1533_v37 = vmax.f32 %v1517_v44, 0.0 }
 0x41f   :  { %v3233_v34 = vadd.f32 %v1534_v4, %v979_v25  ;;  %v1520_v25 = vadd.f32 %v3224_v18, %v1501_v28  ;;  %v1424_v28 = vsel %vm304_vm0, %v3164_v40, 0.0  ;;  %vm2117_vm0 = vcmask 1042434  }
 0x420   :  { %v1455_v53 = vpop.permute.xlu1 %1454  ;;  %v1549_v27 = vadd.f32 %v1533_v37, %v978_v23 }
 0x421   :  { %v1566_v20 = vmax.f32 %v3233_v34, 0.0  ;;  %v1500_v52 = vadd.f32 %v1455_v53, %v1420_v60  ;;  %v1536_v26 = vmax.f32 %v1520_v25, 0.0 }
 0x422   :  { %v1565_v39 = vmax.f32 %v1549_v27, 0.0 }
 0x423   :  { %v1519_v29 = vadd.f32 %v3224_v18, %v1500_v52  ;;  %v3251_v23 = vadd.f32 %v1536_v26, %v981_v31 }
 0x424   :  { %v1586_v17 = vpack.c.bf16 %v1566_v20, %v1565_v39 }
 0x425   :  { %v1535_v41 = vmax.f32 %v1519_v29, 0.0  ;;  %v1568_v4 = vmax.f32 %v3251_v23, 0.0 }
 0x426   :  { %2235 = vmatmul.msk.bf16.vlgmr.msrb.gmra.mxu0 %vm661_vm5, %v1586_v17 }
 0x427   :  { %v1551_v12 = vadd.f32 %v1535_v41, %v980_v36 }
 0x428   :  { %v1463_v27 = vpop.permute.xlu2 %1462 }
 0x429   :  { %v1567_v60 = vmax.f32 %v1551_v12, 0.0  ;;  %v1504_v39 = vadd.f32 %v1463_v27, %v1424_v28 }
 0x42b   :  { %v1587_v37 = vpack.c.bf16 %v1568_v4, %v1567_v60  ;;  %v1523_v6 = vadd.f32 %v3224_v18, %v1504_v39 }
 0x42d   :  { %v1539_v25 = vmax.f32 %v1523_v6, 0.0 }
 0x42f   :  { %v1555_v40 = vadd.f32 %v1539_v25, %v984_v43 }
 0x430   :  { %v1459_v54 = vpop.permute.xlu0 %1458 }
 0x431   :  { %v1502_v44 = vadd.f32 %v1459_v54, %v1422_v32  ;;  %v1426_v32 = vsel %vm306_vm1, %v3174_v22, 0.0  ;;  %v1571_v54 = vmax.f32 %v1555_v40, 0.0  ;;  %vm2120_vm1 = vcmask 1043459  }
 0x433   :  { %v1521_v13 = vadd.f32 %v3224_v18, %v1502_v44 }
 0x435   :  { %v1537_v63 = vmax.f32 %v1521_v13, 0.0 }
 0x436   :  { %2236 = vmatmul.msk.bf16.gmra.mxu0 %vm661_vm5, %v1587_v37 }
 0x437   :  { %v1553_v8 = vadd.f32 %v1537_v63, %v982_v10 }
 0x438   :  { %v1461_v59 = vpop.permute.xlu1 %1460 }
 0x439   :  { %v1503_v36 = vadd.f32 %v1461_v59, %v3159_v2  ;;  %v1569_v29 = vmax.f32 %v1553_v8, 0.0  ;;  %v3595_v59 = vmax.f32 %v2909_v35, 0.0 }
 0x43b   :  { %v1522_v31 = vadd.f32 %v3224_v18, %v1503_v36 }
 0x43d   :  { %v1538_v53 = vmax.f32 %v1522_v31, 0.0 }
 0x43f   :  { %v3267_v52 = vadd.f32 %v1538_v53, %v983_v7 }
 0x440   :  { %v1469_v26 = vpop.permute.xlu2 %1468 }
 0x441   :  { %v1570_v17 = vmax.f32 %v3267_v52, 0.0  ;;  %v1507_v37 = vadd.f32 %v1469_v26, %v3179_v50  ;;  %v1428_v50 = vsel %vm308_vm2, %v3184_v11, 0.0  ;;  %vm2123_vm2 = vcmask 1044484  }
 0x443   :  { %v1588_v2 = vpack.c.bf16 %v1570_v17, %v1569_v29  ;;  %v1526_v46 = vadd.f32 %v3224_v18, %v1507_v37  ;;  %v3596_v29 = vmax.f32 %v2928_v51, 0.0 }
 0x445   :  { %v1542_v13 = vmax.f32 %v1526_v46, 0.0 }
 0x446   :  { %2237 = vmatmul.msk.bf16.gmra.mxu0 %vm661_vm5, %v1588_v2 }
 0x447   :  { %v3299_v63 = vadd.f32 %v1542_v13, %v3595_v59 }
 0x448   :  { %v1465_v10 = vpop.permute.xlu0 %1464 }
 0x449   :  { %v1505_v57 = vadd.f32 %v1465_v10, %v3169_v0  ;;  %v1574_v53 = vmax.f32 %v3299_v63, 0.0  ;;  %v3597_v10 = vmax.f32 %v2926_v24, 0.0 }
 0x44b   :  { %v1524_v7 = vadd.f32 %v3224_v18, %v1505_v57  ;;  %v1430_v57 = vsel %vm310_vm3, %v3197_v3, 0.0  ;;  %vm2126_vm3 = vcmask 1045509  }
 0x44d   :  { %v1540_v41 = vmax.f32 %v1524_v7, 0.0 }
 0x44f   :  { %v3283_v12 = vadd.f32 %v1540_v41, %v985_v62 }
 0x450   :  { %v1467_v60 = vpop.permute.xlu1 %1466 }
 0x451   :  { %v1572_v44 = vmax.f32 %v3283_v12, 0.0  ;;  %v1506_v0 = vadd.f32 %v1467_v60, %v1426_v32 }
 0x453   :  { %v1589_v45 = vpack.c.bf16 %v1572_v44, %v1571_v54  ;;  %v1525_v43 = vadd.f32 %v3224_v18, %v1506_v0  ;;  %v3598_v54 = vmax.f32 %v2943_v5, 0.0 }
 0x455   :  { %v1541_v62 = vmax.f32 %v1525_v43, 0.0 }
 0x456   :  { %2238 = vmatmul.msk.bf16.gmra.mxu0 %vm661_vm5, %v1589_v45  ;;  %v3599_v45 = vmax.f32 %v2945_v9, 0.0 }
 0x457   :  { %v1557_v22 = vadd.f32 %v1541_v62, %v986_v16  ;;  %v1432_v62 = vsel %vm312_vm4, %v3210_v48, 0.0  ;;  %vm2129_vm4 = vcmask 1046534  }
 0x458   :  { %v1475_v6 = vpop.permute.xlu2 %1474 }
 0x459   :  { %v1573_v36 = vmax.f32 %v1557_v22, 0.0  ;;  %v1510_v7 = vadd.f32 %v1475_v6, %v1430_v57 }
 0x45b   :  { %v1590_v27 = vpack.c.bf16 %v1574_v53, %v1573_v36  ;;  %v1529_v51 = vadd.f32 %v3224_v18, %v1510_v7 }
 0x45d   :  { %v1545_v60 = vmax.f32 %v1529_v51, 0.0 }
 0x45f   :  { %v1561_v3 = vadd.f32 %v1545_v60, %v3598_v54 }
 0x460   :  { %v1471_v31 = vpop.permute.xlu0 %1470 }
 0x461   :  { %v1508_v8 = vadd.f32 %v1471_v31, %v1428_v50  ;;  %v1577_v13 = vmax.f32 %v1561_v3, 0.0 }
 0x463   :  { %v1527_v28 = vadd.f32 %v3224_v18, %v1508_v8  ;;  %v3600_v8 = vmax.f32 %v2962_v56, 0.0 }
 0x465   :  { %v1543_v35 = vmax.f32 %v1527_v28, 0.0 }
 0x466   :  { %2239 = vmatmul.msk.bf16.gmra.mxu0 %vm661_vm5, %v1590_v27  ;;  %v3601_v27 = vmax.f32 %v2960_v61, 0.0 }
 0x467   :  { %v1559_v11 = vadd.f32 %v1543_v35, %v3596_v29 }
 0x468   :  { %v1473_v33 = vpop.permute.xlu1 %1472 }
 0x469   :  { %v1509_v16 = vadd.f32 %v1473_v33, %v3189_v42  ;;  %v1575_v40 = vmax.f32 %v1559_v11, 0.0 }
 0x46b   :  { %v1528_v39 = vadd.f32 %v3224_v18, %v1509_v16 }
 0x46d   :  { %v1544_v2 = vmax.f32 %v1528_v39, 0.0 }
 0x46f   :  { %v3315_v25 = vadd.f32 %v1544_v2, %v3597_v10 }
 0x470   :  { %v1481_v37 = vpop.permute.xlu2 %1480 }
 0x471   :  { %v1576_v41 = vmax.f32 %v3315_v25, 0.0  ;;  %v1513_v59 = vadd.f32 %v1481_v37, %v3219_v30 }
 0x473   :  { %v1591_v42 = vpack.c.bf16 %v1576_v41, %v1575_v40  ;;  %v1532_v9 = vadd.f32 %v3224_v18, %v1513_v59 }
 0x475   :  { %v1548_v31 = vmax.f32 %v1532_v9, 0.0 }
 0x476   :  { %2240 = vmatmul.msk.bf16.gmra.mxu0 %vm661_vm5, %v1591_v42 }
 0x477   :  { %v3347_v28 = vadd.f32 %v1548_v31, %v3601_v27 }
 0x478   :  { %v1477_v26 = vpop.permute.xlu0 %1476 }
 0x479   :  { %v1511_v24 = vadd.f32 %v1477_v26, %v3205_v38  ;;  %v1580_v30 = vmax.f32 %v3347_v28, 0.0 }
 0x47b   :  { %v1530_v32 = vadd.f32 %v3224_v18, %v1511_v24 }
 0x47d   :  { %v1546_v0 = vmax.f32 %v1530_v32, 0.0 }
 0x47f   :  { %v3331_v43 = vadd.f32 %v1546_v0, %v3599_v45 }
 0x480   :  { %v1479_v46 = vpop.permute.xlu1 %1478 }
 0x481   :  { %v1578_v22 = vmax.f32 %v3331_v43, 0.0  ;;  %v1512_v38 = vadd.f32 %v1479_v46, %v1432_v62  ;;  %v2080_v43 = vld [vmem:[%s3582_s14] sm:$0x1] }
 0x483   :  { %v1592_v5 = vpack.c.bf16 %v1578_v22, %v1577_v13  ;;  %v1531_v36 = vadd.f32 %v3224_v18, %v1512_v38 }
 0x485   :  { %v1547_v50 = vmax.f32 %v1531_v36, 0.0 }
 0x486   :  { %2241 = vmatmul.msk.bf16.gmra.mxu0 %vm661_vm5, %v1592_v5 }
 0x487   :  { %v1563_v48 = vadd.f32 %v1547_v50, %v3600_v8 }
 0x489   :  { %v1579_v33 = vmax.f32 %v1563_v48, 0.0  ;;  %v2269_v48 = vld [vmem:[%s3580_s12 + $0x8] sm:$0xff] }
 0x48a   :  { %1930 = vmatpush.bf16.msrb.mxu1 %v2269_v48 }
 0x48b   :  { %v1593_v35 = vpack.c.bf16 %v1580_v30, %v1579_v33 }
 0x496   :  { %2242 = vmatmul.msk.bf16.gmra.mxu0 %vm661_vm5, %v1593_v35  ;;  %v2268_v35 = vld [vmem:[%s3580_s12] sm:$0xff] }
 0x497   :  { %1931 = vmatpush.bf16.msrb.mxu1 %v2268_v35 }
 0x4a3   :  { %v3353_v18 = vpop.f32.mrf.mxu0 }
 0x4a4   :  { %1776 = vrot.lane.b32.xlu0 %v3353_v18, %s2311_s25  ;;  %v1679_v61 = vrot.slane %v3353_v18, 4 }
 0x4ab   :  { %v1641_v56 = vpop.f32.mrf.mxu0 }
 0x4ac   :  { %v1680_v16 = vrot.slane %v1641_v56, 4  ;;  %1778 = vrot.lane.b32.xlu1 %v1641_v56, %s2311_s25 }
 0x4ae   :  { %v3364_v39 = vsel %vm1695_vm6, %v1679_v61, %v1680_v16 }
 0x4b3   :  { %v1644_v29 = vpop.f32.mrf.mxu0 }
 0x4b4   :  { %v1681_v11 = vrot.slane %v1644_v29, 4  ;;  %1780 = vrot.lane.b32.xlu2 %v1644_v29, %s2311_s25 }
 0x4b6   :  { %v3369_v2 = vsel %vm1695_vm6, %v1680_v16, %v1681_v11 }
 0x4bb   :  { %v1646_v6 = vpop.f32.mrf.mxu0 }
 0x4bc   :  { %v1682_v10 = vrot.slane %v1646_v6, 4  ;;  %1782 = vrot.lane.b32.xlu0 %v1646_v6, %s2311_s25 }
 0x4be   :  { %v3374_v57 = vsel %vm1695_vm6, %v1681_v11, %v1682_v10 }
 0x4c3   :  { %v1649_v7 = vpop.f32.mrf.mxu0 }
 0x4c4   :  { %v1683_v40 = vrot.slane %v1649_v7, 4  ;;  %1784 = vrot.lane.b32.xlu1 %v1649_v7, %s2311_s25 }
 0x4c6   :  { %v3379_v42 = vsel %vm1695_vm6, %v1682_v10, %v1683_v40 }
 0x4cb   :  { %v1651_v51 = vpop.f32.mrf.mxu0 }
 0x4cc   :  { %v1684_v26 = vrot.slane %v1651_v51, 4  ;;  %1786 = vrot.lane.b32.xlu2 %v1651_v51, %s2311_s25 }
 0x4ce   :  { %v3384_v60 = vsel %vm1695_vm6, %v1683_v40, %v1684_v26 }
 0x4d3   :  { %v1654_v24 = vpop.f32.mrf.mxu0 }
 0x4d4   :  { %v1685_v32 = vrot.slane %v1654_v24, 4  ;;  %1788 = vrot.lane.b32.xlu0 %v1654_v24, %s2311_s25 }
 0x4d6   :  { %v3389_v54 = vsel %vm1695_vm6, %v1684_v26, %v1685_v32 }
 0x4d7   :  { %v1750_v1 = vsel %vm320_vm10, %v3389_v54, 0.0 }
 0x4db   :  { %v1656_v3 = vpop.f32.mrf.mxu0 }
 0x4dc   :  { %v1686_v0 = vrot.slane %v1656_v3, 4  ;;  %1790 = vrot.lane.b32.xlu1 %v1656_v3, %s2311_s25  ;;  %v3450_v3 = vld [vmem:[%s3579_s11] ss:$0 sm:$0xff] }
 0x4de   :  { %v3394_v37 = vsel %vm1695_vm6, %v1685_v32, %v1686_v0 }
 0x4e3   :  { %v1659_v45 = vpop.f32.mrf.mxu0 }
 0x4e4   :  { %v1687_v46 = vrot.slane %v1659_v45, 4  ;;  %1792 = vrot.lane.b32.xlu2 %v1659_v45, %s2311_s25 }
 0x4e6   :  { %v3399_v62 = vsel %vm1695_vm6, %v1686_v0, %v1687_v46 }
 0x4e7   :  { %v1752_v58 = vsel %vm322_vm11, %v3399_v62, 0.0 }
 0x4eb   :  { %v1661_v13 = vpop.f32.mrf.mxu0 }
 0x4ec   :  { %v1688_v38 = vrot.slane %v1661_v13, 4  ;;  %1794 = vrot.lane.b32.xlu0 %v1661_v13, %s2311_s25 }
 0x4ee   :  { %v3404_v59 = vsel %vm1695_vm6, %v1687_v46, %v1688_v38 }
 0x4f3   :  { %v1664_v5 = vpop.f32.mrf.mxu0 }
 0x4f4   :  { %v1689_v36 = vrot.slane %v1664_v5, 4  ;;  %1796 = vrot.lane.b32.xlu1 %v1664_v5, %s2311_s25 }
 0x4f6   :  { %v3409_v9 = vsel %vm1695_vm6, %v1688_v38, %v1689_v36 }
 0x4fb   :  { %v1666_v50 = vpop.f32.mrf.mxu0 }
 0x4fc   :  { %v1690_v31 = vrot.slane %v1666_v50, 4  ;;  %1798 = vrot.lane.b32.xlu2 %v1666_v50, %s2311_s25  ;;  %v1746_v50 = vsel %vm316_vm8, %v3369_v2, 0.0 }
 0x4fe   :  { %v3414_v8 = vsel %vm1695_vm6, %v1689_v36, %v1690_v31 }
 0x503   :  { %v1669_v27 = vpop.f32.mrf.mxu0 }
 0x504   :  { %v1691_v33 = vrot.slane %v1669_v27, 4  ;;  %1800 = vrot.lane.b32.xlu0 %v1669_v27, %s2311_s25 }
 0x506   :  { %v3425_v56 = vsel %vm1695_vm6, %v1690_v31, %v1691_v33 }
 0x507   :  { %v1756_v55 = vsel %vm326_vm13, %v3425_v56, 0.0 }
 0x50b   :  { %v1671_v16 = vpop.f32.mrf.mxu0 }
 0x50c   :  { %v1692_v29 = vrot.slane %v1671_v16, 4  ;;  %1802 = vrot.lane.b32.xlu1 %v1671_v16, %s2311_s25 }
 0x50e   :  { %v3430_v11 = vsel %vm1695_vm6, %v1691_v33, %v1692_v29  ;;  %v1781_v36 = vpop.permute.xlu2 %1780 }
 0x50f   :  { %v1826_v31 = vadd.f32 %v1781_v36, %v1746_v50 }
 0x511   :  { %v1845_v27 = vadd.f32 %v3450_v3, %v1826_v31 }
 0x513   :  { %v1674_v6 = vpop.f32.mrf.mxu0  ;;  %v1861_v16 = vmax.f32 %v1845_v27, 0.0 }
 0x514   :  { %v1693_v10 = vrot.slane %v1674_v6, 4  ;;  %1804 = vrot.lane.b32.xlu2 %v1674_v6, %s2311_s25 }
 0x516   :  { %v3435_v7 = vsel %vm1695_vm6, %v1692_v29, %v1693_v10  ;;  %v1777_v0 = vpop.permute.xlu0 %1776 }
 0x517   :  { %v1758_v21 = vsel %vm328_vm14, %v3435_v7, 0.0 }
 0x51b   :  { %v1676_v40 = vpop.f32.mrf.mxu0 }
 0x51c   :  { %v1694_v51 = vrot.slane %v1676_v40, 4  ;;  %1806 = vrot.lane.b32.xlu0 %v1676_v40, %s2311_s25  ;;  %v1748_v40 = vsel %vm318_vm9, %v3379_v42, 0.0 }
 0x51e   :  { %v1711_v26 = vsel %vm1695_vm6, %v1694_v51, %v1679_v61  ;;  %v1779_v24 = vpop.permute.xlu1 %1778  ;;  %v3445_v32 = vsel %vm1695_vm6, %v1693_v10, %v1694_v51 }
 0x51f   :  { %v1744_v49 = vsel %vm314_vm7, %v1711_v26, 0.0  ;;  %v1825_v45 = vadd.f32 %v1779_v24, %v3364_v39  ;;  %vm2153_vm7 = vcmask 57344  }
 0x520   :  { %v1824_v46 = vadd.f32 %v1777_v0, %v1744_v49 }
 0x521   :  { %v1844_v18 = vadd.f32 %v3450_v3, %v1825_v45 }
 0x522   :  { %v1843_v13 = vadd.f32 %v3450_v3, %v1824_v46 }
 0x523   :  { %v1860_v61 = vmax.f32 %v1844_v18, 0.0 }
 0x524   :  { %v1859_v38 = vmax.f32 %v1843_v13, 0.0 }
 0x526   :  { %v1880_v5 = vpack.c.bf16 %v1860_v61, %v1859_v38  ;;  %v1787_v33 = vpop.permute.xlu2 %1786 }
 0x527   :  { %v1829_v29 = vadd.f32 %v1787_v33, %v3384_v60 }
 0x528   :  { %2251 = vmatmul.msk.bf16.vlgmr.msrb.gmra.mxu1 %vm661_vm5, %v1880_v5 }
 0x529   :  { %v1848_v2 = vadd.f32 %v3450_v3, %v1829_v29 }
 0x52b   :  { %v1864_v26 = vmax.f32 %v1848_v2, 0.0 }
 0x52e   :  { %v1783_v48 = vpop.permute.xlu0 %1782 }
 0x52f   :  { %v1827_v39 = vadd.f32 %v1783_v48, %v3374_v57 }
 0x531   :  { %v1846_v35 = vadd.f32 %v3450_v3, %v1827_v39 }
 0x533   :  { %v1862_v6 = vmax.f32 %v1846_v35, 0.0 }
 0x535   :  { %v1881_v15 = vpack.c.bf16 %v1862_v6, %v1861_v16  ;;  %v1754_v16 = vsel %vm324_vm12, %v3409_v9, 0.0 }
 0x536   :  { %v1785_v10 = vpop.permute.xlu1 %1784 }
 0x537   :  { %v1828_v51 = vadd.f32 %v1785_v10, %v1748_v40 }
 0x538   :  { %2252 = vmatmul.msk.bf16.gmra.mxu1 %vm661_vm5, %v1881_v15 }
 0x539   :  { %v1847_v57 = vadd.f32 %v3450_v3, %v1828_v51 }
 0x53b   :  { %v1863_v24 = vmax.f32 %v1847_v57, 0.0 }
 0x53d   :  { %v1882_v0 = vpack.c.bf16 %v1864_v26, %v1863_v24 }
 0x53e   :  { %v1793_v5 = vpop.permute.xlu2 %1792 }
 0x53f   :  { %v1832_v36 = vadd.f32 %v1793_v5, %v1752_v58 }
 0x541   :  { %v1851_v50 = vadd.f32 %v3450_v3, %v1832_v36 }
 0x543   :  { %v1867_v27 = vmax.f32 %v1851_v50, 0.0 }
 0x546   :  { %v1789_v60 = vpop.permute.xlu0 %1788 }
 0x547   :  { %v1830_v49 = vadd.f32 %v1789_v60, %v1750_v1 }
 0x548   :  { %2253 = vmatmul.msk.bf16.gmra.mxu1 %vm661_vm5, %v1882_v0 }
 0x549   :  { %v1849_v42 = vadd.f32 %v3450_v3, %v1830_v49 }
 0x54b   :  { %v1865_v13 = vmax.f32 %v1849_v42, 0.0 }
 0x54e   :  { %v1791_v45 = vpop.permute.xlu1 %1790 }
 0x54f   :  { %v1831_v46 = vadd.f32 %v1791_v45, %v3394_v37 }
 0x551   :  { %v1850_v18 = vadd.f32 %v3450_v3, %v1831_v46 }
 0x553   :  { %v1866_v61 = vmax.f32 %v1850_v18, 0.0 }
 0x555   :  { %v1883_v38 = vpack.c.bf16 %v1866_v61, %v1865_v13 }
 0x556   :  { %v1799_v48 = vpop.permute.xlu2 %1798 }
 0x557   :  { %v1835_v39 = vadd.f32 %v1799_v48, %v3414_v8 }
 0x558   :  { %2254 = vmatmul.msk.bf16.gmra.mxu1 %vm661_vm5, %v1883_v38 }
 0x559   :  { %v1854_v62 = vadd.f32 %v3450_v3, %v1835_v39 }
 0x55b   :  { %v1870_v6 = vmax.f32 %v1854_v62, 0.0 }
 0x55e   :  { %v1795_v54 = vpop.permute.xlu0 %1794 }
 0x55f   :  { %v1833_v31 = vadd.f32 %v1795_v54, %v3404_v59 }
 0x561   :  { %v1852_v37 = vadd.f32 %v3450_v3, %v1833_v31 }
 0x563   :  { %v1868_v33 = vmax.f32 %v1852_v37, 0.0 }
 0x565   :  { %v1884_v14 = vpack.c.bf16 %v1868_v33, %v1867_v27 }
 0x566   :  { %v1797_v35 = vpop.permute.xlu1 %1796 }
 0x567   :  { %v1834_v29 = vadd.f32 %v1797_v35, %v1754_v16 }
 0x568   :  { %2255 = vmatmul.msk.bf16.gmra.mxu1 %vm661_vm5, %v1884_v14 }
 0x569   :  { %v1853_v59 = vadd.f32 %v3450_v3, %v1834_v29 }
 0x56b   :  { %v1869_v15 = vmax.f32 %v1853_v59, 0.0 }
 0x56d   :  { %v1885_v10 = vpack.c.bf16 %v1870_v6, %v1869_v15 }
 0x56e   :  { %v1805_v60 = vpop.permute.xlu2 %1804 }
 0x56f   :  { %v1838_v1 = vadd.f32 %v1805_v60, %v1758_v21 }
 0x571   :  { %v1857_v49 = vadd.f32 %v3450_v3, %v1838_v1 }
 0x573   :  { %v1873_v42 = vmax.f32 %v1857_v49, 0.0 }
 0x576   :  { %v1801_v8 = vpop.permute.xlu0 %1800 }
 0x577   :  { %v1836_v40 = vadd.f32 %v1801_v8, %v1756_v55 }
 0x578   :  { %2256 = vmatmul.msk.bf16.gmra.mxu1 %vm661_vm5, %v1885_v10 }
 0x579   :  { %v1855_v9 = vadd.f32 %v3450_v3, %v1836_v40 }
 0x57b   :  { %v1871_v26 = vmax.f32 %v1855_v9, 0.0 }
 0x57e   :  { %v1803_v2 = vpop.permute.xlu1 %1802 }
 0x57f   :  { %v1837_v51 = vadd.f32 %v1803_v2, %v3430_v11 }
 0x581   :  { %v1856_v57 = vadd.f32 %v3450_v3, %v1837_v51 }
 0x583   :  { %v1872_v24 = vmax.f32 %v1856_v57, 0.0 }
 0x585   :  { %v1886_v0 = vpack.c.bf16 %v1872_v24, %v1871_v26 }
 0x588   :  { %2257 = vmatmul.msk.bf16.gmra.mxu1 %vm661_vm5, %v1886_v0  ;;  %v3528_v0 = vld [vmem:[%s3581_s13] ss:$0 sm:$0xff] }
 0x58e   :  { %v1807_v56 = vpop.permute.xlu0 %1806 }
 0x58f   :  { %v1839_v45 = vadd.f32 %v1807_v56, %v3445_v32 }
 0x591   :  { %v1858_v11 = vadd.f32 %v3450_v3, %v1839_v45 }
 0x593   :  { %v1874_v46 = vmax.f32 %v1858_v11, 0.0 }
 0x595   :  { %v1887_v18 = vpack.c.bf16 %v1874_v46, %v1873_v42 }
 0x598   :  { %2258 = vmatmul.msk.bf16.gmra.mxu1 %vm661_vm5, %v1887_v18 }
 0x5a5   :  { %v1933_v13 = vpop.f32.mrf.mxu1 }
 0x5a6   :  { %v1973_v61 = vrot.slane %v1933_v13, 4 }
 0x5ad   :  { %v1935_v19 = vpop.f32.mrf.mxu1 }
 0x5ae   :  { %v1974_v38 = vrot.slane %v1935_v19, 4  ;;  %2013 = vrot.lane.b32.xlu1 %v1935_v19, %s2311_s25 }
 0x5b0   :  { %v1996_v7 = vsel %vm1695_vm6, %v1973_v61, %v1974_v38 }
 0x5b5   :  { %v1938_v5 = vpop.f32.mrf.mxu1 }
 0x5b6   :  { %v1975_v36 = vrot.slane %v1938_v5, 4 }
 0x5bd   :  { %v1940_v58 = vpop.f32.mrf.mxu1 }
 0x5be   :  { %v1976_v32 = vrot.slane %v1940_v58, 4  ;;  %2015 = vrot.lane.b32.xlu2 %v1940_v58, %s2311_s25 }
 0x5c0   :  { %v1995_v3 = vsel %vm1695_vm6, %v1975_v36, %v1976_v32 }
 0x5c5   :  { %v1943_v54 = vpop.f32.mrf.mxu1 }
 0x5c6   :  { %v1977_v31 = vrot.slane %v1943_v54, 4 }
 0x5cd   :  { %v1945_v50 = vpop.f32.mrf.mxu1 }
 0x5ce   :  { %v1978_v48 = vrot.slane %v1945_v50, 4  ;;  %2017 = vrot.lane.b32.xlu0 %v1945_v50, %s2311_s25 }
 0x5d0   :  { %v1994_v37 = vsel %vm1695_vm6, %v1977_v31, %v1978_v48 }
 0x5d5   :  { %v1948_v27 = vpop.f32.mrf.mxu1 }
 0x5d6   :  { %v1979_v33 = vrot.slane %v1948_v27, 4 }
 0x5dd   :  { %v1950_v39 = vpop.f32.mrf.mxu1 }
 0x5de   :  { %v1980_v14 = vrot.slane %v1950_v39, 4  ;;  %2019 = vrot.lane.b32.xlu1 %v1950_v39, %s2311_s25 }
 0x5e0   :  { %v3510_v35 = vsel %vm1695_vm6, %v1979_v33, %v1980_v14 }
 0x5e5   :  { %v1953_v16 = vpop.f32.mrf.mxu1 }
 0x5e6   :  { %v1981_v29 = vrot.slane %v1953_v16, 4 }
 0x5ed   :  { %v1955_v62 = vpop.f32.mrf.mxu1 }
 0x5ee   :  { %v1982_v59 = vrot.slane %v1955_v62, 4  ;;  %2021 = vrot.lane.b32.xlu2 %v1955_v62, %s2311_s25 }
 0x5f0   :  { %v1992_v6 = vsel %vm1695_vm6, %v1981_v29, %v1982_v59 }
 0x5f5   :  { %v1958_v15 = vpop.f32.mrf.mxu1 }
 0x5f6   :  { %v1983_v8 = vrot.slane %v1958_v15, 4 }
 0x5fd   :  { %v1960_v10 = vpop.f32.mrf.mxu1 }
 0x5fe   :  { %v1984_v55 = vrot.slane %v1960_v10, 4  ;;  %2023 = vrot.lane.b32.xlu0 %v1960_v10, %s2311_s25 }
 0x600   :  { %v3518_v40 = vsel %vm1695_vm6, %v1983_v8, %v1984_v55 }
 0x605   :  { %v1963_v2 = vpop.f32.mrf.mxu1 }
 0x606   :  { %v1985_v51 = vrot.slane %v1963_v2, 4 }
 0x60d   :  { %v1965_v9 = vpop.f32.mrf.mxu1 }
 0x60e   :  { %v1986_v57 = vrot.slane %v1965_v9, 4  ;;  %2025 = vrot.lane.b32.xlu1 %v1965_v9, %s2311_s25 }
 0x610   :  { %v3523_v26 = vsel %vm1695_vm6, %v1985_v51, %v1986_v57 }
 0x615   :  { %v1968_v24 = vpop.f32.mrf.mxu1 }
 0x616   :  { %v1987_v45 = vrot.slane %v1968_v24, 4 }
 0x618   :  { %v2016_v60 = vpop.permute.xlu2 %2015 }
 0x619   :  { %v2038_v21 = vadd.f32 %v2016_v60, %v1995_v3 }
 0x61b   :  { %v2049_v1 = vadd.f32 %v3528_v0, %v2038_v21 }
 0x61d   :  { %v2057_v56 = vmax.f32 %v2049_v1, 0.0  ;;  %v1970_v49 = vpop.f32.mrf.mxu1 }
 0x61e   :  { %v1988_v11 = vrot.slane %v1970_v49, 4  ;;  %2027 = vrot.lane.b32.xlu2 %v1970_v49, %s2311_s25 }
 0x61f   :  { %v2065_v42 = vadd.f32 %v2057_v56, %v1568_v4 }
 0x620   :  { %v2014_v46 = vpop.permute.xlu1 %2013  ;;  %v1989_v18 = vsel %vm1695_vm6, %v1987_v45, %v1988_v11  ;;  %vm2131_vm6 = vcmask 1047559  }
 0x621   :  { %v2037_v13 = vadd.f32 %v2014_v46, %v1996_v7  ;;  %v2073_v19 = vmax.f32 %v2065_v42, 0.0 }
 0x623   :  { %v2048_v61 = vadd.f32 %v3528_v0, %v2037_v13  ;;  %v2083_v5 = vpack.c.bf16 %v2073_v19, %v2073_v19  ;;  %v2081_v13 = vld [vmem:[#allocation2] sm:$0x1]  ;;  %v2313_v19 = vmov 0  }
 0x624   :  { %2277 = vset.pattern.permute.xlu0 %v2313_v19 }
 0x625   :  { %v2056_v38 = vmax.f32 %v2048_v61, 0.0  ;;  %v2105_v32 = vunpack.c.l.b16 %v2083_v5  ;;  %2092 = vperm.xlu0 %2277, %v2081_v13  }
 0x627   :  { %v2064_v58 = vadd.f32 %v2056_v38, %v1566_v20  ;;  %v2113_v23 = vrot.slane %v2105_v32, 6 }
 0x629   :  { %v2072_v36 = vmax.f32 %v2064_v58, 0.0 }
 0x62b   :  { %v2082_v3 = vpack.c.bf16 %v2072_v36, %v2072_v36 }
 0x62d   :  { %v2104_v54 = vunpack.c.l.b16 %v2082_v3 }
 0x62f   :  { %v2112_v4 = vrot.slane %v2104_v54, 7 }
 0x631   :  { %v2115_v50 = vsel %vm2114_vm15, %v2113_v23, %v2112_v4 }
 0x640   :  { %v2018_v31 = vpop.permute.xlu0 %2017 }
 0x641   :  { %v2039_v47 = vadd.f32 %v2018_v31, %v1994_v37 }
 0x643   :  { %v2050_v7 = vadd.f32 %v3528_v0, %v2039_v47 }
 0x645   :  { %v2058_v48 = vmax.f32 %v2050_v7, 0.0 }
 0x647   :  { %v2066_v27 = vadd.f32 %v2058_v48, %v1570_v17 }
 0x648   :  { %v2022_v39 = vpop.permute.xlu2 %2021 }
 0x649   :  { %v2074_v33 = vmax.f32 %v2066_v27, 0.0  ;;  %v2041_v34 = vadd.f32 %v2022_v39, %v1992_v6 }
 0x64b   :  { %v2084_v20 = vpack.c.bf16 %v2074_v33, %v2074_v33  ;;  %v2052_v14 = vadd.f32 %v3528_v0, %v2041_v34 }
 0x64d   :  { %v2106_v16 = vunpack.c.l.b16 %v2084_v20  ;;  %v2060_v62 = vmax.f32 %v2052_v14, 0.0 }
 0x64f   :  { %v2116_v29 = vrot.slane %v2106_v16, 5  ;;  %v2068_v59 = vadd.f32 %v2060_v62, %v1574_v53 }
 0x650   :  { %v2020_v37 = vpop.permute.xlu1 %2019 }
 0x651   :  { %v2118_v15 = vsel %vm2117_vm0, %v2116_v29, %v2115_v50  ;;  %v2040_v10 = vadd.f32 %v2020_v37, %v3510_v35  ;;  %v2076_v17 = vmax.f32 %v2068_v59, 0.0 }
 0x653   :  { %v2051_v52 = vadd.f32 %v3528_v0, %v2040_v10  ;;  %v2086_v55 = vpack.c.bf16 %v2076_v17, %v2076_v17 }
 0x655   :  { %v2059_v8 = vmax.f32 %v2051_v52, 0.0  ;;  %v2108_v51 = vunpack.c.l.b16 %v2086_v55 }
 0x657   :  { %v2067_v6 = vadd.f32 %v2059_v8, %v1572_v44  ;;  %v2122_v63 = vrot.slane %v2108_v51, 3 }
 0x659   :  { %v2075_v2 = vmax.f32 %v2067_v6, 0.0 }
 0x65b   :  { %v2085_v9 = vpack.c.bf16 %v2075_v2, %v2075_v2 }
 0x65d   :  { %v2107_v57 = vunpack.c.l.b16 %v2085_v9 }
 0x65f   :  { %v2119_v24 = vrot.slane %v2107_v57, 4 }
 0x661   :  { %v2121_v53 = vsel %vm2120_vm1, %v2119_v24, %v2118_v15 }
 0x662   :  { %v2124_v60 = vsel %vm2123_vm2, %v2122_v63, %v2121_v53 }
 0x670   :  { %v2024_v21 = vpop.permute.xlu0 %2023 }
 0x671   :  { %v2042_v35 = vadd.f32 %v2024_v21, %v3518_v40 }
 0x673   :  { %v2053_v1 = vadd.f32 %v3528_v0, %v2042_v35 }
 0x675   :  { %v2061_v56 = vmax.f32 %v2053_v1, 0.0 }
 0x677   :  { %v2069_v12 = vadd.f32 %v2061_v56, %v1576_v41 }
 0x678   :  { %v2028_v44 = vpop.permute.xlu2 %2027 }
 0x679   :  { %v2077_v49 = vmax.f32 %v2069_v12, 0.0  ;;  %v2044_v45 = vadd.f32 %v2028_v44, %v1989_v18 }
 0x67b   :  { %v2087_v11 = vpack.c.bf16 %v2077_v49, %v2077_v49  ;;  %v2055_v42 = vadd.f32 %v3528_v0, %v2044_v45 }
 0x67d   :  { %v2109_v46 = vunpack.c.l.b16 %v2087_v11  ;;  %v2063_v40 = vmax.f32 %v2055_v42, 0.0 }
 0x67f   :  { %v2125_v61 = vrot.slane %v2109_v46, 2  ;;  %v2071_v41 = vadd.f32 %v2063_v40, %v1580_v30 }
 0x680   :  { %v2026_v38 = vpop.permute.xlu1 %2025 }
 0x681   :  { %v2043_v5 = vadd.f32 %v2026_v38, %v3523_v26  ;;  %v2127_v58 = vsel %vm2126_vm3, %v2125_v61, %v2124_v60  ;;  %v2079_v32 = vmax.f32 %v2071_v41, 0.0 }
 0x683   :  { %v2054_v25 = vadd.f32 %v3528_v0, %v2043_v5  ;;  %v2089_v23 = vpack.c.bf16 %v2079_v32, %v2079_v32 }
 0x685   :  { %v2062_v18 = vmax.f32 %v2054_v25, 0.0  ;;  %v2111_v31 = vunpack.c.l.b16 %v2089_v23 }
 0x687   :  { %v2070_v36 = vadd.f32 %v2062_v18, %v1578_v22 }
 0x689   :  { %v2078_v3 = vmax.f32 %v2070_v36, 0.0 }
 0x68b   :  { %v2088_v54 = vpack.c.bf16 %v2078_v3, %v2078_v3 }
 0x68d   :  { %v2110_v4 = vunpack.c.l.b16 %v2088_v54 }
 0x68f   :  { %v2128_v50 = vrot.slane %v2110_v4, 1 }
 0x691   :  { %v2130_v26 = vsel %vm2129_vm4, %v2128_v50, %v2127_v58 }
 0x692   :  { %v2132_v47 = vsel %vm2131_vm6, %v2111_v31, %v2130_v26 }
 0x693   :  { %v2133_v7 = vpack.c.b16 %v2132_v47, %v2132_v47 }
 0x695   :  { %v2138_v0 = vsel %vm661_vm5, %v2133_v7, 0 }
 0x696   :  { %2147 = vmatpush.bf16.xpose.msra.mxu2 %v2138_v0 }
 0x697   :  { %v2093_v22 = vpop.permute.xlu0 %2092 }
 0x698   :  { %v2095_v28 = vperm.slane %v2093_v22, 0 }
 0x69d   :  { %2259 = vmatmul.msk.bf16.vlgmr.msra.gmra.mxu2 %vm661_vm5, %v2080_v43 }
 0x720   :  { %v2149_v30 = vpop.f32.mrf.mxu2 }
 0x721   :  { %v2150_v48 = vadd.f32 %v2149_v30, %v2095_v28 }
 0x723   :  { %2154 = vst.msk [vmem:[#allocation3] sm:$0x1] %vm2153_vm7, %v2150_v48 }
 0x724   :  { %2165 = dma.vmem_to_hbm [thread:$0]  %s2161_s2, 16, %s2163_s18, [#allocation4]  }
 0x728   :  { %v2151_v27 = vpop.f32.mrf.mxu2 }
 0x729   :  { %2309 = dma.done.wait [#allocation4], 16  }
 0x72a   :  { %2310 = vsyncadd [#allocation4], 4294967280 }
 0x72b   :  { %2170 = vsyncpa [#allocation4], 1 }

</bundles_post_ra>
